<compile_context>
chip_gen: v7x
topology: tpu7x:2x2x1
jax: 0.10.0
libtpu: 0.0.40
codegen_flags: <defaults>
</compile_context>

<pallas_src>
import jax
import jax.numpy as jnp
from jax import lax
from jax.experimental import pallas as pl
from jax.experimental.pallas import tpu as pltpu

# ----------------------------- configuration --------------------------------
B, T = 2, 16                 # batch, sequence length
IN_DIM, OUT_DIM, EMB_DIM = 8, 16, 32
KSIZE = 3
COND_PREDICT_SCALE = True
# GroupNorm1d(dim, 8, 4) -> nn.GroupNorm(min(8, dim // 4), dim)
NUM_GROUPS = min(8, OUT_DIM // 4)
EPS = 1e-5
COND_DIM = 2 * OUT_DIM if COND_PREDICT_SCALE else OUT_DIM

# ----------------------- packed-parameter slab layout ------------------------
# Matrix slab WMAT (row ranges; width padded to WM_COLS with zeros):
R_W1 = 0                       # conv1 taps packed:        (OUT_DIM, 3*IN_DIM)
R_W2 = R_W1 + OUT_DIM          # conv2 taps packed:        (OUT_DIM, 3*OUT_DIM)
R_WC = R_W2 + OUT_DIM          # cond Linear, transposed:  (COND_DIM, EMB_DIM)
R_WR = R_WC + COND_DIM         # residual 1x1, transposed: (OUT_DIM, IN_DIM)
R_P = R_WR + OUT_DIM           # group-averaging matrix:   (OUT_DIM, OUT_DIM)
WM_ROWS = R_P + OUT_DIM
WM_COLS = max(3 * IN_DIM, 3 * OUT_DIM, EMB_DIM, IN_DIM, OUT_DIM)

# Vector slab VEC (each parameter stored as a column):
#   col 0..6: b1, g1, be1, b2, g2, be2, bres (rows 0:OUT_DIM)
#   col 7   : bc (rows 0:COND_DIM)
VEC_ROWS = max(OUT_DIM, COND_DIM)
VEC_COLS = 8


# ------------------------------ shared math ----------------------------------
def _mish(x):
    # x * tanh(softplus(x)); softplus uses the torch threshold=20 convention.
    sp = jnp.where(x > 20.0, x, jnp.log1p(jnp.exp(jnp.minimum(x, 20.0))))
    return x * jnp.tanh(sp)


# ------------------------------- Pallas kernel --------------------------------
def chi_resblock_kernel(x_ref, embT_ref, wm_ref, vec_ref, o_ref):
    f32 = jnp.float32

    # --- unpack parameters (static slices of the two packed slabs) -----------
    w1 = wm_ref[R_W1:R_W1 + OUT_DIM, 0:3 * IN_DIM]        # (Cout, 3*Cin)
    w2 = wm_ref[R_W2:R_W2 + OUT_DIM, 0:3 * OUT_DIM]       # (Cout, 3*Cout)
    wcT = wm_ref[R_WC:R_WC + COND_DIM, 0:EMB_DIM]         # (COND_DIM, E)
    wresT = wm_ref[R_WR:R_WR + OUT_DIM, 0:IN_DIM]         # (Cout, Cin)
    p = wm_ref[R_P:R_P + OUT_DIM, 0:OUT_DIM]              # (Cout, Cout)

    b1 = vec_ref[0:OUT_DIM, 0:1]
    g1 = vec_ref[0:OUT_DIM, 1:2]
    be1 = vec_ref[0:OUT_DIM, 2:3]
    b2 = vec_ref[0:OUT_DIM, 3:4]
    g2 = vec_ref[0:OUT_DIM, 4:5]
    be2 = vec_ref[0:OUT_DIM, 5:6]
    bres = vec_ref[0:OUT_DIM, 6:7]
    bc = vec_ref[0:COND_DIM, 7:8]

    # --- hoisted conv boundary masks (reused for both convs & both batches) --
    tcol = lax.broadcasted_iota(jnp.int32, (1, T), 1)
    m_first = (tcol > 0).astype(f32)        # zero at t == 0
    m_last = (tcol < T - 1).astype(f32)     # zero at t == T-1

    # --- cond encoder: Mish -> Linear, both batches in one matmul ------------
    e = _mish(embT_ref[...].astype(f32))                              # (E, B)
    embed = jnp.dot(wcT, e, preferred_element_type=f32) + bc          # (COND_DIM, B)

    def conv3(xb, wcat, bcol):
        # xb: (Cin, T) channels-on-sublanes / time-on-lanes.
        # 'same' 3-tap conv as ONE matmul over the tap-concatenated input.
        x_prev = pltpu.roll(xb, 1, axis=1) * m_first       # x[:, t-1]
        x_next = pltpu.roll(xb, T - 1, axis=1) * m_last    # x[:, t+1]
        xcat = jnp.concatenate([x_prev, xb, x_next], axis=0)   # (3*Cin, T)
        return jnp.dot(wcat, xcat, preferred_element_type=f32) + bcol

    def group_norm(y, gamma, beta):
        # y: (Cout, T). Group stats via the P group-averaging matmul; mean and
        # E[x^2] are produced by a single (Cout, Cout) @ (Cout, 2) matmul.
        s = jnp.concatenate(
            [jnp.sum(y, axis=1, keepdims=True),
             jnp.sum(y * y, axis=1, keepdims=True)], axis=1)        # (Cout, 2)
        m = jnp.dot(p, s, preferred_element_type=f32)               # (Cout, 2)
        mean = m[:, 0:1]
        var = m[:, 1:2] - mean * mean
        return (y - mean) * lax.rsqrt(var + EPS) * gamma + beta

    for b in range(B):                       # B = 2, fully unrolled
        xb = x_ref[b].astype(f32)            # (Cin, T), native NCT layout

        # conv1: Conv1d -> GroupNorm -> Mish
        h = _mish(group_norm(conv3(xb, w1, b1), g1, be1))

        # FiLM-style conditioning
        if COND_PREDICT_SCALE:
            scale = embed[0:OUT_DIM, b:b + 1]               # (Cout, 1)
            bias = embed[OUT_DIM:COND_DIM, b:b + 1]
            h = scale * h + bias
        else:
            h = h + embed[0:OUT_DIM, b:b + 1]

        # conv2: Conv1d -> GroupNorm -> Mish
        h = _mish(group_norm(conv3(h, w2, b2), g2, be2))

        # residual 1x1 conv (in_dim != out_dim here)
        res = jnp.dot(wresT, xb, preferred_element_type=f32) + bres
        o_ref[b] = (h + res).astype(o_ref.dtype)            # (Cout, T), NCT


# --------------------------------- wrapper ------------------------------------
def chi_residual_block(x_nct, emb, wmat, vec):
    # x_nct: (B, Cin, T) like PyTorch; emb: (B, EMB_DIM).
    # Activations stay in NCT layout end-to-end; only the tiny emb is transposed.
    embT = jnp.transpose(emb)                # (E, B)

    def full(shape):
        return pl.BlockSpec(shape, lambda i: (0,) * len(shape))

    return pl.pallas_call(
        chi_resblock_kernel,
        out_shape=jax.ShapeDtypeStruct((B, OUT_DIM, T), x_nct.dtype),
        grid=(1,),                           # single invocation; B loop unrolled in-kernel
        in_specs=[
            full((B, IN_DIM, T)),            # x (native NCT)
            full((EMB_DIM, B)),              # emb^T
            full((WM_ROWS, WM_COLS)),        # packed matrices
            full((VEC_ROWS, VEC_COLS)),      # packed per-channel vectors
        ],
        out_specs=full((B, OUT_DIM, T)),
        # On v7x a "parallel" batch axis would shard across the 2 TensorCores,
        # but at B=2 grid overhead vs. the split is a wash; keep one step.
        compiler_params=pltpu.CompilerParams(dimension_semantics=("arbitrary",)),
    )(x_nct, embT, wmat, vec)


# -------------------------- deterministic parameters ---------------------------
def init_params(key):
    ks = jax.random.split(key, 12)
    w1 = 0.2 * jax.random.normal(ks[0], (KSIZE, IN_DIM, OUT_DIM), jnp.float32)
    b1 = 0.1 * jax.random.normal(ks[1], (1, OUT_DIM), jnp.float32)
    g1 = 1.0 + 0.05 * jax.random.normal(ks[2], (1, OUT_DIM), jnp.float32)
    be1 = 0.05 * jax.random.normal(ks[3], (1, OUT_DIM), jnp.float32)
    w2 = 0.2 * jax.random.normal(ks[4], (KSIZE, OUT_DIM, OUT_DIM), jnp.float32)
    b2 = 0.1 * jax.random.normal(ks[5], (1, OUT_DIM), jnp.float32)
    g2 = 1.0 + 0.05 * jax.random.normal(ks[6], (1, OUT_DIM), jnp.float32)
    be2 = 0.05 * jax.random.normal(ks[7], (1, OUT_DIM), jnp.float32)
    wc = 0.2 * jax.random.normal(ks[8], (EMB_DIM, COND_DIM), jnp.float32)
    bc = 0.1 * jax.random.normal(ks[9], (1, COND_DIM), jnp.float32)
    wres = 0.2 * jax.random.normal(ks[10], (IN_DIM, OUT_DIM), jnp.float32)
    bres = 0.1 * jax.random.normal(ks[11], (1, OUT_DIM), jnp.float32)

    # group-averaging matrix P[c, c'] = 1/(T*Cg) if c, c' in the same group.
    cg = OUT_DIM // NUM_GROUPS
    gid = jnp.arange(OUT_DIM) // cg
    p = (gid[:, None] == gid[None, :]).astype(jnp.float32) / float(T * cg)
    return (w1, b1, g1, be1, w2, b2, g2, be2, wc, bc, wres, bres, p)


def pack_params(params):
    """One-time packing: 13 small arrays -> 2 slabs (matrices + vectors)."""
    w1, b1, g1, be1, w2, b2, g2, be2, wc, bc, wres, bres, p = params

    # Conv taps packed so y = Wcat @ concat([x[t-1]; x[t]; x[t+1]], rows).
    w1cat = jnp.transpose(w1.reshape(KSIZE * IN_DIM, OUT_DIM))    # (Cout, 3*Cin)
    w2cat = jnp.transpose(w2.reshape(KSIZE * OUT_DIM, OUT_DIM))   # (Cout, 3*Cout)
    wcT = jnp.transpose(wc)                                       # (COND_DIM, E)
    wresT = jnp.transpose(wres)                                   # (Cout, Cin)

    wmat = jnp.zeros((WM_ROWS, WM_COLS), jnp.float32)
    wmat = wmat.at[R_W1:R_W1 + OUT_DIM, :3 * IN_DIM].set(w1cat)
    wmat = wmat.at[R_W2:R_W2 + OUT_DIM, :3 * OUT_DIM].set(w2cat)
    wmat = wmat.at[R_WC:R_WC + COND_DIM, :EMB_DIM].set(wcT)
    wmat = wmat.at[R_WR:R_WR + OUT_DIM, :IN_DIM].set(wresT)
    wmat = wmat.at[R_P:R_P + OUT_DIM, :OUT_DIM].set(p)

    vec = jnp.zeros((VEC_ROWS, VEC_COLS), jnp.float32)
    for j, v in enumerate([b1, g1, be1, b2, g2, be2, bres]):
        vec = vec.at[:OUT_DIM, j].set(v.reshape(-1))
    vec = vec.at[:COND_DIM, 7].set(bc.reshape(-1))
    return wmat, vec


# ------------------------------ pure-JAX reference ------------------------------
def ref_forward(x_nct, emb, params):
    w1, b1, g1, be1, w2, b2, g2, be2, wc, bc, wres, bres, _ = params

    def conv1d_same(x, w_kio, b):
        w_oik = jnp.transpose(w_kio, (2, 1, 0))       # (Cout, Cin, K) like torch
        y = lax.conv_general_dilated(x, w_oik, window_strides=(1,),
                                     padding=((KSIZE // 2, KSIZE // 2),),
                                     dimension_numbers=("NCH", "OIH", "NCH"))
        return y + b.reshape(1, -1, 1)

    def gn(y, gamma, beta):
        bn, c, tn = y.shape
        yr = y.reshape(bn, NUM_GROUPS, c // NUM_GROUPS, tn)
        mean = yr.mean(axis=(2, 3), keepdims=True)
        var = yr.var(axis=(2, 3), keepdims=True)
        yn = ((yr - mean) / jnp.sqrt(var + EPS)).reshape(bn, c, tn)
        return yn * gamma.reshape(1, -1, 1) + beta.reshape(1, -1, 1)

    out = _mish(gn(conv1d_same(x_nct, w1, b1), g1, be1))
    embed = _mish(emb) @ wc + bc.reshape(1, -1)
    if COND_PREDICT_SCALE:
        out = embed[:, :OUT_DIM, None] * out + embed[:, OUT_DIM:, None]
    else:
        out = out + embed[:, :, None]
    out = _mish(gn(conv1d_same(out, w2, b2), g2, be2))
    res = jnp.einsum("bct,co->bot", x_nct, wres) + bres.reshape(1, -1, 1)
    return out + res


# ----------------------------------- main --------------------------------------
if __name__ == "__main__":
    key = jax.random.PRNGKey(0)
    kx, ke, kp = jax.random.split(key, 3)
    x = jax.random.normal(kx, (B, IN_DIM, T), jnp.float32)     # NCT like PyTorch
    emb = jax.random.normal(ke, (B, EMB_DIM), jnp.float32)
    params = init_params(kp)
    wmat, vec = pack_params(params)                            # one-time packing

    out = jax.block_until_ready(chi_residual_block(x, emb, wmat, vec))
    ref = jax.block_until_ready(ref_forward(x, emb, params))

    assert out.shape == (B, OUT_DIM, T), out.shape
    err = float(jnp.max(jnp.abs(out - ref)))
    if err < 1e-3:
        print("KERNEL_OK")
    else:
        print(f"MISMATCH max_abs_err={err}")
</pallas_src>

<mosaic_0001>
module attributes {stable_mosaic.version = 11 : i64} {
  func.func @chi_resblock_kernel(%arg0: i32, %arg1: memref<2x8x16xf32, #tpu.memory_space<vmem>>, %arg2: memref<32x2xf32, #tpu.memory_space<vmem>>, %arg3: memref<96x48xf32, #tpu.memory_space<vmem>>, %arg4: memref<32x8xf32, #tpu.memory_space<vmem>>, %arg5: memref<2x16x16xf32, #tpu.memory_space<vmem>>) attributes {dimension_semantics = [#tpu.dimension_semantics<arbitrary>], iteration_bounds = array<i64: 1>, scalar_prefetch = 0 : i64, scratch_operands = 0 : i64, tpu.core_type = #tpu.core_type<tc>, window_params = [{pipeline_mode = #tpu.pipeline_mode<synchronous>, transform_indices = @transform_0, window_bounds = array<i64: 2, 8, 16>}, {pipeline_mode = #tpu.pipeline_mode<synchronous>, transform_indices = @transform_1, window_bounds = array<i64: 32, 2>}, {pipeline_mode = #tpu.pipeline_mode<synchronous>, transform_indices = @transform_2, window_bounds = array<i64: 96, 48>}, {pipeline_mode = #tpu.pipeline_mode<synchronous>, transform_indices = @transform_3, window_bounds = array<i64: 32, 8>}, {pipeline_mode = #tpu.pipeline_mode<synchronous>, transform_indices = @transform_4, window_bounds = array<i64: 2, 16, 16>}]} {
    %c0 = arith.constant 0 : index
    %c0_0 = arith.constant 0 : index
    %0 = vector.load %arg3[%c0, %c0_0] : memref<96x48xf32, #tpu.memory_space<vmem>>, vector<16x24xf32>
    %c16 = arith.constant 16 : index
    %c0_1 = arith.constant 0 : index
    %1 = vector.load %arg3[%c16, %c0_1] : memref<96x48xf32, #tpu.memory_space<vmem>>, vector<16x48xf32>
    %c32 = arith.constant 32 : index
    %c0_2 = arith.constant 0 : index
    %2 = vector.load %arg3[%c32, %c0_2] : memref<96x48xf32, #tpu.memory_space<vmem>>, vector<32x32xf32>
    %c64 = arith.constant 64 : index
    %c0_3 = arith.constant 0 : index
    %3 = vector.load %arg3[%c64, %c0_3] : memref<96x48xf32, #tpu.memory_space<vmem>>, vector<16x8xf32>
    %c80 = arith.constant 80 : index
    %c0_4 = arith.constant 0 : index
    %4 = vector.load %arg3[%c80, %c0_4] : memref<96x48xf32, #tpu.memory_space<vmem>>, vector<16x16xf32>
    %c0_5 = arith.constant 0 : index
    %c0_6 = arith.constant 0 : index
    %5 = vector.load %arg4[%c0_5, %c0_6] : memref<32x8xf32, #tpu.memory_space<vmem>>, vector<16x1xf32>
    %c0_7 = arith.constant 0 : index
    %c1 = arith.constant 1 : index
    %6 = vector.load %arg4[%c0_7, %c1] : memref<32x8xf32, #tpu.memory_space<vmem>>, vector<16x1xf32>
    %c0_8 = arith.constant 0 : index
    %c2 = arith.constant 2 : index
    %7 = vector.load %arg4[%c0_8, %c2] : memref<32x8xf32, #tpu.memory_space<vmem>>, vector<16x1xf32>
    %c0_9 = arith.constant 0 : index
    %c3 = arith.constant 3 : index
    %8 = vector.load %arg4[%c0_9, %c3] : memref<32x8xf32, #tpu.memory_space<vmem>>, vector<16x1xf32>
    %c0_10 = arith.constant 0 : index
    %c4 = arith.constant 4 : index
    %9 = vector.load %arg4[%c0_10, %c4] : memref<32x8xf32, #tpu.memory_space<vmem>>, vector<16x1xf32>
    %c0_11 = arith.constant 0 : index
    %c5 = arith.constant 5 : index
    %10 = vector.load %arg4[%c0_11, %c5] : memref<32x8xf32, #tpu.memory_space<vmem>>, vector<16x1xf32>
    %c0_12 = arith.constant 0 : index
    %c6 = arith.constant 6 : index
    %11 = vector.load %arg4[%c0_12, %c6] : memref<32x8xf32, #tpu.memory_space<vmem>>, vector<16x1xf32>
    %c0_13 = arith.constant 0 : index
    %c7 = arith.constant 7 : index
    %12 = vector.load %arg4[%c0_13, %c7] : memref<32x8xf32, #tpu.memory_space<vmem>>, vector<32x1xf32>
    %13 = tpu.iota {dimensions = array<i32: 1>} : vector<1x16xi32>
    %c0_i32 = arith.constant 0 : i32
    %14 = vector.broadcast %c0_i32 : i32 to vector<1x16xi32>
    %15 = arith.cmpi sgt, %13, %14 : vector<1x16xi32>
    %16 = arith.extui %15 : vector<1x16xi1> to vector<1x16xi32>
    %17 = arith.sitofp %16 : vector<1x16xi32> to vector<1x16xf32>
    %c15_i32 = arith.constant 15 : i32
    %18 = vector.broadcast %c15_i32 : i32 to vector<1x16xi32>
    %19 = arith.cmpi slt, %13, %18 : vector<1x16xi32>
    %20 = arith.extui %19 : vector<1x16xi1> to vector<1x16xi32>
    %21 = arith.sitofp %20 : vector<1x16xi32> to vector<1x16xf32>
    %c0_14 = arith.constant 0 : index
    %c0_15 = arith.constant 0 : index
    %22 = vector.load %arg2[%c0_14, %c0_15] : memref<32x2xf32, #tpu.memory_space<vmem>>, vector<32x2xf32>
    %cst = arith.constant 2.000000e+01 : f32
    %23 = vector.broadcast %cst : f32 to vector<32x2xf32>
    %24 = arith.cmpf ogt, %22, %23 : vector<32x2xf32>
    %cst_16 = arith.constant 2.000000e+01 : f32
    %25 = vector.broadcast %cst_16 : f32 to vector<32x2xf32>
    %26 = arith.minimumf %22, %25 : vector<32x2xf32>
    %27 = math.exp %26 : vector<32x2xf32>
    %28 = math.log1p %27 : vector<32x2xf32>
    %29 = arith.select %24, %22, %28 : vector<32x2xi1>, vector<32x2xf32>
    %30 = math.tanh %29 : vector<32x2xf32>
    %31 = arith.mulf %22, %30 : vector<32x2xf32>
    %cst_17 = arith.constant dense<0.000000e+00> : vector<32x2xf32>
    %32 = tpu.matmul %2, %31, %cst_17 {dimension_numbers = #tpu.dot_dimension_numbers<[1], [0], [0], [1], [0, 0, 1, 1], [], []>} : vector<32x32xf32>, vector<32x2xf32>, vector<32x2xf32> -> vector<32x2xf32>
    %33 = vector.broadcast %12 : vector<32x1xf32> to vector<32x2xf32>
    %34 = arith.addf %32, %33 : vector<32x2xf32>
    %c0_18 = arith.constant 0 : index
    %c0_19 = arith.constant 0 : index
    %c0_20 = arith.constant 0 : index
    %35 = vector.load %arg1[%c0_18, %c0_19, %c0_20] : memref<2x8x16xf32, #tpu.memory_space<vmem>>, vector<1x8x16xf32>
    %36 = vector.shape_cast %35 : vector<1x8x16xf32> to vector<8x16xf32>
    %c1_i32 = arith.constant 1 : i32
    %37 = tpu.dynamic_rotate %36 by %c1_i32 dim 1 : vector<8x16xf32>, i32 -> vector<8x16xf32>
    %38 = vector.broadcast %17 : vector<1x16xf32> to vector<8x16xf32>
    %39 = arith.mulf %37, %38 : vector<8x16xf32>
    %c15_i32_21 = arith.constant 15 : i32
    %40 = tpu.dynamic_rotate %36 by %c15_i32_21 dim 1 : vector<8x16xf32>, i32 -> vector<8x16xf32>
    %41 = vector.broadcast %21 : vector<1x16xf32> to vector<8x16xf32>
    %42 = arith.mulf %40, %41 : vector<8x16xf32>
    %43 = tpu.concatenate %39, %36, %42 in 0 : vector<8x16xf32>, vector<8x16xf32>, vector<8x16xf32> -> vector<24x16xf32>
    %cst_22 = arith.constant dense<0.000000e+00> : vector<16x16xf32>
    %44 = tpu.matmul %0, %43, %cst_22 {dimension_numbers = #tpu.dot_dimension_numbers<[1], [0], [0], [1], [0, 0, 1, 1], [], []>} : vector<16x24xf32>, vector<24x16xf32>, vector<16x16xf32> -> vector<16x16xf32>
    %45 = vector.broadcast %5 : vector<16x1xf32> to vector<16x16xf32>
    %46 = arith.addf %44, %45 : vector<16x16xf32>
    %cst_23 = arith.constant dense<0.000000e+00> : vector<16xf32>
    %47 = vector.multi_reduction <add>, %46, %cst_23 [1] : vector<16x16xf32> to vector<16xf32>
    %48 = vector.shape_cast %47 : vector<16xf32> to vector<16x1xf32>
    %49 = arith.mulf %46, %46 : vector<16x16xf32>
    %cst_24 = arith.constant dense<0.000000e+00> : vector<16xf32>
    %50 = vector.multi_reduction <add>, %49, %cst_24 [1] : vector<16x16xf32> to vector<16xf32>
    %51 = vector.shape_cast %50 : vector<16xf32> to vector<16x1xf32>
    %52 = tpu.concatenate %48, %51 in 1 : vector<16x1xf32>, vector<16x1xf32> -> vector<16x2xf32>
    %cst_25 = arith.constant dense<0.000000e+00> : vector<16x2xf32>
    %53 = tpu.matmul %4, %52, %cst_25 {dimension_numbers = #tpu.dot_dimension_numbers<[1], [0], [0], [1], [0, 0, 1, 1], [], []>} : vector<16x16xf32>, vector<16x2xf32>, vector<16x2xf32> -> vector<16x2xf32>
    %54 = vector.extract_strided_slice %53 {offsets = [0, 0], sizes = [16, 1], strides = [1, 1]} : vector<16x2xf32> to vector<16x1xf32>
    %55 = vector.extract_strided_slice %53 {offsets = [0, 1], sizes = [16, 1], strides = [1, 1]} : vector<16x2xf32> to vector<16x1xf32>
    %56 = arith.mulf %54, %54 : vector<16x1xf32>
    %57 = arith.subf %55, %56 : vector<16x1xf32>
    %58 = vector.broadcast %54 : vector<16x1xf32> to vector<16x16xf32>
    %59 = arith.subf %46, %58 : vector<16x16xf32>
    %cst_26 = arith.constant 9.99999974E-6 : f32
    %60 = vector.broadcast %cst_26 : f32 to vector<16x1xf32>
    %61 = arith.addf %57, %60 : vector<16x1xf32>
    %62 = math.rsqrt %61 : vector<16x1xf32>
    %63 = vector.broadcast %62 : vector<16x1xf32> to vector<16x16xf32>
    %64 = arith.mulf %59, %63 : vector<16x16xf32>
    %65 = vector.broadcast %6 : vector<16x1xf32> to vector<16x16xf32>
    %66 = arith.mulf %64, %65 : vector<16x16xf32>
    %67 = vector.broadcast %7 : vector<16x1xf32> to vector<16x16xf32>
    %68 = arith.addf %66, %67 : vector<16x16xf32>
    %cst_27 = arith.constant 2.000000e+01 : f32
    %69 = vector.broadcast %cst_27 : f32 to vector<16x16xf32>
    %70 = arith.cmpf ogt, %68, %69 : vector<16x16xf32>
    %cst_28 = arith.constant 2.000000e+01 : f32
    %71 = vector.broadcast %cst_28 : f32 to vector<16x16xf32>
    %72 = arith.minimumf %68, %71 : vector<16x16xf32>
    %73 = math.exp %72 : vector<16x16xf32>
    %74 = math.log1p %73 : vector<16x16xf32>
    %75 = arith.select %70, %68, %74 : vector<16x16xi1>, vector<16x16xf32>
    %76 = math.tanh %75 : vector<16x16xf32>
    %77 = arith.mulf %68, %76 : vector<16x16xf32>
    %78 = vector.extract_strided_slice %34 {offsets = [0, 0], sizes = [16, 1], strides = [1, 1]} : vector<32x2xf32> to vector<16x1xf32>
    %79 = vector.extract_strided_slice %34 {offsets = [16, 0], sizes = [16, 1], strides = [1, 1]} : vector<32x2xf32> to vector<16x1xf32>
    %80 = vector.broadcast %78 : vector<16x1xf32> to vector<16x16xf32>
    %81 = arith.mulf %80, %77 : vector<16x16xf32>
    %82 = vector.broadcast %79 : vector<16x1xf32> to vector<16x16xf32>
    %83 = arith.addf %81, %82 : vector<16x16xf32>
    %c1_i32_29 = arith.constant 1 : i32
    %84 = tpu.dynamic_rotate %83 by %c1_i32_29 dim 1 : vector<16x16xf32>, i32 -> vector<16x16xf32>
    %85 = vector.broadcast %17 : vector<1x16xf32> to vector<16x16xf32>
    %86 = arith.mulf %84, %85 : vector<16x16xf32>
    %c15_i32_30 = arith.constant 15 : i32
    %87 = tpu.dynamic_rotate %83 by %c15_i32_30 dim 1 : vector<16x16xf32>, i32 -> vector<16x16xf32>
    %88 = vector.broadcast %21 : vector<1x16xf32> to vector<16x16xf32>
    %89 = arith.mulf %87, %88 : vector<16x16xf32>
    %90 = tpu.concatenate %86, %83, %89 in 0 : vector<16x16xf32>, vector<16x16xf32>, vector<16x16xf32> -> vector<48x16xf32>
    %cst_31 = arith.constant dense<0.000000e+00> : vector<16x16xf32>
    %91 = tpu.matmul %1, %90, %cst_31 {dimension_numbers = #tpu.dot_dimension_numbers<[1], [0], [0], [1], [0, 0, 1, 1], [], []>} : vector<16x48xf32>, vector<48x16xf32>, vector<16x16xf32> -> vector<16x16xf32>
    %92 = vector.broadcast %8 : vector<16x1xf32> to vector<16x16xf32>
    %93 = arith.addf %91, %92 : vector<16x16xf32>
    %cst_32 = arith.constant dense<0.000000e+00> : vector<16xf32>
    %94 = vector.multi_reduction <add>, %93, %cst_32 [1] : vector<16x16xf32> to vector<16xf32>
    %95 = vector.shape_cast %94 : vector<16xf32> to vector<16x1xf32>
    %96 = arith.mulf %93, %93 : vector<16x16xf32>
    %cst_33 = arith.constant dense<0.000000e+00> : vector<16xf32>
    %97 = vector.multi_reduction <add>, %96, %cst_33 [1] : vector<16x16xf32> to vector<16xf32>
    %98 = vector.shape_cast %97 : vector<16xf32> to vector<16x1xf32>
    %99 = tpu.concatenate %95, %98 in 1 : vector<16x1xf32>, vector<16x1xf32> -> vector<16x2xf32>
    %cst_34 = arith.constant dense<0.000000e+00> : vector<16x2xf32>
    %100 = tpu.matmul %4, %99, %cst_34 {dimension_numbers = #tpu.dot_dimension_numbers<[1], [0], [0], [1], [0, 0, 1, 1], [], []>} : vector<16x16xf32>, vector<16x2xf32>, vector<16x2xf32> -> vector<16x2xf32>
    %101 = vector.extract_strided_slice %100 {offsets = [0, 0], sizes = [16, 1], strides = [1, 1]} : vector<16x2xf32> to vector<16x1xf32>
    %102 = vector.extract_strided_slice %100 {offsets = [0, 1], sizes = [16, 1], strides = [1, 1]} : vector<16x2xf32> to vector<16x1xf32>
    %103 = arith.mulf %101, %101 : vector<16x1xf32>
    %104 = arith.subf %102, %103 : vector<16x1xf32>
    %105 = vector.broadcast %101 : vector<16x1xf32> to vector<16x16xf32>
    %106 = arith.subf %93, %105 : vector<16x16xf32>
    %cst_35 = arith.constant 9.99999974E-6 : f32
    %107 = vector.broadcast %cst_35 : f32 to vector<16x1xf32>
    %108 = arith.addf %104, %107 : vector<16x1xf32>
    %109 = math.rsqrt %108 : vector<16x1xf32>
    %110 = vector.broadcast %109 : vector<16x1xf32> to vector<16x16xf32>
    %111 = arith.mulf %106, %110 : vector<16x16xf32>
    %112 = vector.broadcast %9 : vector<16x1xf32> to vector<16x16xf32>
    %113 = arith.mulf %111, %112 : vector<16x16xf32>
    %114 = vector.broadcast %10 : vector<16x1xf32> to vector<16x16xf32>
    %115 = arith.addf %113, %114 : vector<16x16xf32>
    %cst_36 = arith.constant 2.000000e+01 : f32
    %116 = vector.broadcast %cst_36 : f32 to vector<16x16xf32>
    %117 = arith.cmpf ogt, %115, %116 : vector<16x16xf32>
    %cst_37 = arith.constant 2.000000e+01 : f32
    %118 = vector.broadcast %cst_37 : f32 to vector<16x16xf32>
    %119 = arith.minimumf %115, %118 : vector<16x16xf32>
    %120 = math.exp %119 : vector<16x16xf32>
    %121 = math.log1p %120 : vector<16x16xf32>
    %122 = arith.select %117, %115, %121 : vector<16x16xi1>, vector<16x16xf32>
    %123 = math.tanh %122 : vector<16x16xf32>
    %124 = arith.mulf %115, %123 : vector<16x16xf32>
    %cst_38 = arith.constant dense<0.000000e+00> : vector<16x16xf32>
    %125 = tpu.matmul %3, %36, %cst_38 {dimension_numbers = #tpu.dot_dimension_numbers<[1], [0], [0], [1], [0, 0, 1, 1], [], []>} : vector<16x8xf32>, vector<8x16xf32>, vector<16x16xf32> -> vector<16x16xf32>
    %126 = vector.broadcast %11 : vector<16x1xf32> to vector<16x16xf32>
    %127 = arith.addf %125, %126 : vector<16x16xf32>
    %128 = arith.addf %124, %127 : vector<16x16xf32>
    %c0_39 = arith.constant 0 : index
    %c0_40 = arith.constant 0 : index
    %c0_41 = arith.constant 0 : index
    %129 = vector.load %arg5[%c0_39, %c0_40, %c0_41] : memref<2x16x16xf32, #tpu.memory_space<vmem>>, vector<1x16x16xf32>
    %130 = vector.shape_cast %129 : vector<1x16x16xf32> to vector<16x16xf32>
    %131 = vector.shape_cast %128 : vector<16x16xf32> to vector<1x16x16xf32>
    tpu.vector_store %arg5[%c0_39, %c0_40, %c0_41], %131 {strides = array<i32>} : memref<2x16x16xf32, #tpu.memory_space<vmem>>, vector<1x16x16xf32>,
    %c1_42 = arith.constant 1 : index
    %c0_43 = arith.constant 0 : index
    %c0_44 = arith.constant 0 : index
    %132 = vector.load %arg1[%c1_42, %c0_43, %c0_44] : memref<2x8x16xf32, #tpu.memory_space<vmem>>, vector<1x8x16xf32>
    %133 = vector.shape_cast %132 : vector<1x8x16xf32> to vector<8x16xf32>
    %c1_i32_45 = arith.constant 1 : i32
    %134 = tpu.dynamic_rotate %133 by %c1_i32_45 dim 1 : vector<8x16xf32>, i32 -> vector<8x16xf32>
    %135 = vector.broadcast %17 : vector<1x16xf32> to vector<8x16xf32>
    %136 = arith.mulf %134, %135 : vector<8x16xf32>
    %c15_i32_46 = arith.constant 15 : i32
    %137 = tpu.dynamic_rotate %133 by %c15_i32_46 dim 1 : vector<8x16xf32>, i32 -> vector<8x16xf32>
    %138 = vector.broadcast %21 : vector<1x16xf32> to vector<8x16xf32>
    %139 = arith.mulf %137, %138 : vector<8x16xf32>
    %140 = tpu.concatenate %136, %133, %139 in 0 : vector<8x16xf32>, vector<8x16xf32>, vector<8x16xf32> -> vector<24x16xf32>
    %cst_47 = arith.constant dense<0.000000e+00> : vector<16x16xf32>
    %141 = tpu.matmul %0, %140, %cst_47 {dimension_numbers = #tpu.dot_dimension_numbers<[1], [0], [0], [1], [0, 0, 1, 1], [], []>} : vector<16x24xf32>, vector<24x16xf32>, vector<16x16xf32> -> vector<16x16xf32>
    %142 = vector.broadcast %5 : vector<16x1xf32> to vector<16x16xf32>
    %143 = arith.addf %141, %142 : vector<16x16xf32>
    %cst_48 = arith.constant dense<0.000000e+00> : vector<16xf32>
    %144 = vector.multi_reduction <add>, %143, %cst_48 [1] : vector<16x16xf32> to vector<16xf32>
    %145 = vector.shape_cast %144 : vector<16xf32> to vector<16x1xf32>
    %146 = arith.mulf %143, %143 : vector<16x16xf32>
    %cst_49 = arith.constant dense<0.000000e+00> : vector<16xf32>
    %147 = vector.multi_reduction <add>, %146, %cst_49 [1] : vector<16x16xf32> to vector<16xf32>
    %148 = vector.shape_cast %147 : vector<16xf32> to vector<16x1xf32>
    %149 = tpu.concatenate %145, %148 in 1 : vector<16x1xf32>, vector<16x1xf32> -> vector<16x2xf32>
    %cst_50 = arith.constant dense<0.000000e+00> : vector<16x2xf32>
    %150 = tpu.matmul %4, %149, %cst_50 {dimension_numbers = #tpu.dot_dimension_numbers<[1], [0], [0], [1], [0, 0, 1, 1], [], []>} : vector<16x16xf32>, vector<16x2xf32>, vector<16x2xf32> -> vector<16x2xf32>
    %151 = vector.extract_strided_slice %150 {offsets = [0, 0], sizes = [16, 1], strides = [1, 1]} : vector<16x2xf32> to vector<16x1xf32>
    %152 = vector.extract_strided_slice %150 {offsets = [0, 1], sizes = [16, 1], strides = [1, 1]} : vector<16x2xf32> to vector<16x1xf32>
    %153 = arith.mulf %151, %151 : vector<16x1xf32>
    %154 = arith.subf %152, %153 : vector<16x1xf32>
    %155 = vector.broadcast %151 : vector<16x1xf32> to vector<16x16xf32>
    %156 = arith.subf %143, %155 : vector<16x16xf32>
    %cst_51 = arith.constant 9.99999974E-6 : f32
    %157 = vector.broadcast %cst_51 : f32 to vector<16x1xf32>
    %158 = arith.addf %154, %157 : vector<16x1xf32>
    %159 = math.rsqrt %158 : vector<16x1xf32>
    %160 = vector.broadcast %159 : vector<16x1xf32> to vector<16x16xf32>
    %161 = arith.mulf %156, %160 : vector<16x16xf32>
    %162 = vector.broadcast %6 : vector<16x1xf32> to vector<16x16xf32>
    %163 = arith.mulf %161, %162 : vector<16x16xf32>
    %164 = vector.broadcast %7 : vector<16x1xf32> to vector<16x16xf32>
    %165 = arith.addf %163, %164 : vector<16x16xf32>
    %cst_52 = arith.constant 2.000000e+01 : f32
    %166 = vector.broadcast %cst_52 : f32 to vector<16x16xf32>
    %167 = arith.cmpf ogt, %165, %166 : vector<16x16xf32>
    %cst_53 = arith.constant 2.000000e+01 : f32
    %168 = vector.broadcast %cst_53 : f32 to vector<16x16xf32>
    %169 = arith.minimumf %165, %168 : vector<16x16xf32>
    %170 = math.exp %169 : vector<16x16xf32>
    %171 = math.log1p %170 : vector<16x16xf32>
    %172 = arith.select %167, %165, %171 : vector<16x16xi1>, vector<16x16xf32>
    %173 = math.tanh %172 : vector<16x16xf32>
    %174 = arith.mulf %165, %173 : vector<16x16xf32>
    %175 = vector.extract_strided_slice %34 {offsets = [0, 1], sizes = [16, 1], strides = [1, 1]} : vector<32x2xf32> to vector<16x1xf32>
    %176 = vector.extract_strided_slice %34 {offsets = [16, 1], sizes = [16, 1], strides = [1, 1]} : vector<32x2xf32> to vector<16x1xf32>
    %177 = vector.broadcast %175 : vector<16x1xf32> to vector<16x16xf32>
    %178 = arith.mulf %177, %174 : vector<16x16xf32>
    %179 = vector.broadcast %176 : vector<16x1xf32> to vector<16x16xf32>
    %180 = arith.addf %178, %179 : vector<16x16xf32>
    %c1_i32_54 = arith.constant 1 : i32
    %181 = tpu.dynamic_rotate %180 by %c1_i32_54 dim 1 : vector<16x16xf32>, i32 -> vector<16x16xf32>
    %182 = vector.broadcast %17 : vector<1x16xf32> to vector<16x16xf32>
    %183 = arith.mulf %181, %182 : vector<16x16xf32>
    %c15_i32_55 = arith.constant 15 : i32
    %184 = tpu.dynamic_rotate %180 by %c15_i32_55 dim 1 : vector<16x16xf32>, i32 -> vector<16x16xf32>
    %185 = vector.broadcast %21 : vector<1x16xf32> to vector<16x16xf32>
    %186 = arith.mulf %184, %185 : vector<16x16xf32>
    %187 = tpu.concatenate %183, %180, %186 in 0 : vector<16x16xf32>, vector<16x16xf32>, vector<16x16xf32> -> vector<48x16xf32>
    %cst_56 = arith.constant dense<0.000000e+00> : vector<16x16xf32>
    %188 = tpu.matmul %1, %187, %cst_56 {dimension_numbers = #tpu.dot_dimension_numbers<[1], [0], [0], [1], [0, 0, 1, 1], [], []>} : vector<16x48xf32>, vector<48x16xf32>, vector<16x16xf32> -> vector<16x16xf32>
    %189 = vector.broadcast %8 : vector<16x1xf32> to vector<16x16xf32>
    %190 = arith.addf %188, %189 : vector<16x16xf32>
    %cst_57 = arith.constant dense<0.000000e+00> : vector<16xf32>
    %191 = vector.multi_reduction <add>, %190, %cst_57 [1] : vector<16x16xf32> to vector<16xf32>
    %192 = vector.shape_cast %191 : vector<16xf32> to vector<16x1xf32>
    %193 = arith.mulf %190, %190 : vector<16x16xf32>
    %cst_58 = arith.constant dense<0.000000e+00> : vector<16xf32>
    %194 = vector.multi_reduction <add>, %193, %cst_58 [1] : vector<16x16xf32> to vector<16xf32>
    %195 = vector.shape_cast %194 : vector<16xf32> to vector<16x1xf32>
    %196 = tpu.concatenate %192, %195 in 1 : vector<16x1xf32>, vector<16x1xf32> -> vector<16x2xf32>
    %cst_59 = arith.constant dense<0.000000e+00> : vector<16x2xf32>
    %197 = tpu.matmul %4, %196, %cst_59 {dimension_numbers = #tpu.dot_dimension_numbers<[1], [0], [0], [1], [0, 0, 1, 1], [], []>} : vector<16x16xf32>, vector<16x2xf32>, vector<16x2xf32> -> vector<16x2xf32>
    %198 = vector.extract_strided_slice %197 {offsets = [0, 0], sizes = [16, 1], strides = [1, 1]} : vector<16x2xf32> to vector<16x1xf32>
    %199 = vector.extract_strided_slice %197 {offsets = [0, 1], sizes = [16, 1], strides = [1, 1]} : vector<16x2xf32> to vector<16x1xf32>
    %200 = arith.mulf %198, %198 : vector<16x1xf32>
    %201 = arith.subf %199, %200 : vector<16x1xf32>
    %202 = vector.broadcast %198 : vector<16x1xf32> to vector<16x16xf32>
    %203 = arith.subf %190, %202 : vector<16x16xf32>
    %cst_60 = arith.constant 9.99999974E-6 : f32
    %204 = vector.broadcast %cst_60 : f32 to vector<16x1xf32>
    %205 = arith.addf %201, %204 : vector<16x1xf32>
    %206 = math.rsqrt %205 : vector<16x1xf32>
    %207 = vector.broadcast %206 : vector<16x1xf32> to vector<16x16xf32>
    %208 = arith.mulf %203, %207 : vector<16x16xf32>
    %209 = vector.broadcast %9 : vector<16x1xf32> to vector<16x16xf32>
    %210 = arith.mulf %208, %209 : vector<16x16xf32>
    %211 = vector.broadcast %10 : vector<16x1xf32> to vector<16x16xf32>
    %212 = arith.addf %210, %211 : vector<16x16xf32>
    %cst_61 = arith.constant 2.000000e+01 : f32
    %213 = vector.broadcast %cst_61 : f32 to vector<16x16xf32>
    %214 = arith.cmpf ogt, %212, %213 : vector<16x16xf32>
    %cst_62 = arith.constant 2.000000e+01 : f32
    %215 = vector.broadcast %cst_62 : f32 to vector<16x16xf32>
    %216 = arith.minimumf %212, %215 : vector<16x16xf32>
    %217 = math.exp %216 : vector<16x16xf32>
    %218 = math.log1p %217 : vector<16x16xf32>
    %219 = arith.select %214, %212, %218 : vector<16x16xi1>, vector<16x16xf32>
    %220 = math.tanh %219 : vector<16x16xf32>
    %221 = arith.mulf %212, %220 : vector<16x16xf32>
    %cst_63 = arith.constant dense<0.000000e+00> : vector<16x16xf32>
    %222 = tpu.matmul %3, %133, %cst_63 {dimension_numbers = #tpu.dot_dimension_numbers<[1], [0], [0], [1], [0, 0, 1, 1], [], []>} : vector<16x8xf32>, vector<8x16xf32>, vector<16x16xf32> -> vector<16x16xf32>
    %223 = vector.broadcast %11 : vector<16x1xf32> to vector<16x16xf32>
    %224 = arith.addf %222, %223 : vector<16x16xf32>
    %225 = arith.addf %221, %224 : vector<16x16xf32>
    %c1_64 = arith.constant 1 : index
    %c0_65 = arith.constant 0 : index
    %c0_66 = arith.constant 0 : index
    %226 = vector.load %arg5[%c1_64, %c0_65, %c0_66] : memref<2x16x16xf32, #tpu.memory_space<vmem>>, vector<1x16x16xf32>
    %227 = vector.shape_cast %226 : vector<1x16x16xf32> to vector<16x16xf32>
    %228 = vector.shape_cast %225 : vector<16x16xf32> to vector<1x16x16xf32>
    tpu.vector_store %arg5[%c1_64, %c0_65, %c0_66], %228 {strides = array<i32>} : memref<2x16x16xf32, #tpu.memory_space<vmem>>, vector<1x16x16xf32>,
    return
  }
  func.func @transform_0(%arg0: i32) -> (i32, i32, i32) {
    %c0_i32 = arith.constant 0 : i32
    %c0_i32_0 = arith.constant 0 : i32
    %c0_i32_1 = arith.constant 0 : i32
    %c0_i32_2 = arith.constant 0 : i32
    return %c0_i32, %c0_i32_0, %c0_i32_1 : i32, i32, i32
  }
  func.func @transform_1(%arg0: i32) -> (i32, i32) {
    %c0_i32 = arith.constant 0 : i32
    %c0_i32_0 = arith.constant 0 : i32
    %c0_i32_1 = arith.constant 0 : i32
    return %c0_i32, %c0_i32_0 : i32, i32
  }
  func.func @transform_2(%arg0: i32) -> (i32, i32) {
    %c0_i32 = arith.constant 0 : i32
    %c0_i32_0 = arith.constant 0 : i32
    %c0_i32_1 = arith.constant 0 : i32
    return %c0_i32, %c0_i32_0 : i32, i32
  }
  func.func @transform_3(%arg0: i32) -> (i32, i32) {
    %c0_i32 = arith.constant 0 : i32
    %c0_i32_0 = arith.constant 0 : i32
    %c0_i32_1 = arith.constant 0 : i32
    return %c0_i32, %c0_i32_0 : i32, i32
  }
  func.func @transform_4(%arg0: i32) -> (i32, i32, i32) {
    %c0_i32 = arith.constant 0 : i32
    %c0_i32_0 = arith.constant 0 : i32
    %c0_i32_1 = arith.constant 0 : i32
    %c0_i32_2 = arith.constant 0 : i32
    return %c0_i32, %c0_i32_0, %c0_i32_1 : i32, i32, i32
  }
}

</mosaic_0001>

<bundles_post_ra>
// kernel: tpu_custom_call.1
= control target key start
LH: loop header
LB: loop body
LE: loop exit
PB: predicated region body
PF: predicated region fallthrough
CT: control target
= control target key end

     0   :  { %v34_v1 = vlaneseq  ;;  %s2114_s17 = smov 16   ;;  %s2615_s0 = inlined_call_operand.vmem [shape: f32[2,8,16], index: 0, kind: input, shape index: {}]   ;;  %s2616_s1 = inlined_call_operand.vmem [shape: f32[32,2], index: 1, kind: input, shape index: {}]   ;;  %s2617_s2 = inlined_call_operand.vmem [shape: f32[96,48], index: 2, kind: input, shape index: {}]   ;;  %s2618_s3 = inlined_call_operand.vmem [shape: f32[32,8], index: 3, kind: input, shape index: {}]   ;;  %s2619_s4 = inlined_call_operand.hbm [shape: f32[2,16,16], index: 4, kind: output, shape index: {}]  }
   0x1   :  { %v2159_v0 = vld [vmem:[%s2615_s0] sm:$0xff] }
   0x2   :  { %230 = vrot.lane.b32.xlu0 %v2159_v0, %s2114_s17 }
   0x3   :  { %9 = vsyncpa [#allocation3], 0  ;;  %v35_v2 = vand.u32 127, %v34_v1  ;;  %v2115_v3 = vmov 0.0   ;;  %s2116_s18 = smov 1   ;;  %s2117_s19 = smov 15  }
   0x4   :  { %vm229_vm2 = vcmask 1047680   ;;  %s2118_s20 = smov 14   ;;  %s2119_s21 = smov 113   ;;  %v2183_v16 = vld [vmem:[%s2617_s2] sm:$0xff]  ;;  %vm270_vm3 = vcmask 195584   ;;  %v2120_v18 = vmov 0  }
   0x5   :  { %vm39_vm0 = vcmp.lt.s32.totalorder %v35_v2, 15  ;;  %vm36_vm1 = vcmp.gt.s32.totalorder %v35_v2, 0  ;;  %1759 = vmatprep.mubr.msk.f32.mxu1 %vm270_vm3, %v2183_v16  ;;  %v2190_v17 = vld [vmem:[%s2618_s3] sm:$0xff]  ;;  %1918 = vset.pattern.permute.xlu1 %v2120_v18  ;;  %v2199_v20 = vld [vmem:[%s2618_s3 + $0x8] sm:$0xff]  ;;  %vm352_vm4 = vcmask 130048   ;;  %v2232_v39 = vld [vmem:[%s2617_s2 + $0x50] sm:$0xff] }
   0x6   :  { %v1657_v4 = vsel %vm39_vm0, 1.0, %v2115_v3  ;;  %v1656_v5 = vsel %vm36_vm1, 1.0, %v2115_v3  ;;  %1917 = vset.pattern.permute.xlu0 %v2120_v18  ;;  %v2205_v26 = vld [vmem:[%s2617_s2 + $0x8] sm:$0xff]  ;;  %v2239_v40 = vld [vmem:[%s2616_s1] sm:$0xff]  ;;  %v2249_v42 = vld [vmem:[%s2616_s1 + $0x10] sm:$0xff]  ;;  %vm130_vm5 = vcmask 261120  }
   0x7   :  { %242 = vrot.lane.b32.xlu1 %v1657_v4, %s2116_s18  ;;  %v2244_v41 = vld [vmem:[%s2616_s1 + $0x8] sm:$0xff]  ;;  %v50_v43 = vmin.f32 %v2239_v40, 20.0  ;;  %v2256_v45 = vld [vmem:[%s2616_s1 + $0x18] sm:$0xff]  ;;  %v22_v46 = vld [vmem:[%s2617_s2 + $0x20] sm:$0xff]  ;;  %v52_v47 = vmin.f32 %v2249_v42, 20.0  ;;  %vm46_vm7 = vcmp.gt.f32.partialorder %v2239_v40, 20.0 }
   0x8   :  { %v51_v44 = vmin.f32 %v2244_v41, 20.0  ;;  %v53_v48 = vmin.f32 %v2256_v45, 20.0  ;;  %1747 = vmatprep.mubr.msk.f32.mxu0 %vm130_vm5, %v22_v46  ;;  %vm47_vm9 = vcmp.gt.f32.partialorder %v2244_v41, 20.0  ;;  %vm48_vm11 = vcmp.gt.f32.partialorder %v2249_v42, 20.0 }
   0x9   :  { %v54_v49 = vmul.f32 1.442695, %v50_v43  ;;  %v58_v51 = vmul.f32 1.442695, %v52_v47  ;;  %vm49_vm12 = vcmp.gt.f32.partialorder %v2256_v45, 20.0  ;;  %vm367_vm14 = vcmask 7168  }
   0xa   :  { %v56_v50 = vmul.f32 1.442695, %v51_v44  ;;  %v60_v52 = vmul.f32 1.442695, %v53_v48 }
   0xb   :  { %237 = vrot.lane.b32.xlu1 %v1656_v5, %s2117_s19  ;;  %2000 = vpow2.f32 %v54_v49 }
   0xc   :  { %2002 = vpow2.f32 %v56_v50 }
   0xd   :  { %2004 = vpow2.f32 %v58_v51 }
   0xe   :  { %2006 = vpow2.f32 %v60_v52 }
  0x15   :  { %v2001_v53 = vpop.eup %2000 }
  0x16   :  { %v2003_v54 = vpop.eup %2002  ;;  %v62_v55 = vadd.f32 1.0, %v2001_v53  ;;  %v65_v60 = vmul.f32 -0.5, %v2001_v53  ;;  %v68_v3 = vand.u32 2147483647, %v2001_v53 }
  0x17   :  { %v2005_v56 = vpop.eup %2004  ;;  %v71_v57 = vadd.f32 1.0, %v2003_v54  ;;  %v74_v61 = vmul.f32 -0.5, %v2003_v54  ;;  %v77_v5 = vand.u32 2147483647, %v2003_v54 }
  0x18   :  { %v2007_v58 = vpop.eup %2006  ;;  %2008 = vlog2.f32 %v62_v55  ;;  %v80_v59 = vadd.f32 1.0, %v2005_v56  ;;  %v83_v63 = vmul.f32 -0.5, %v2005_v56  ;;  %v66_v1 = vadd.f32 1.0, %v65_v60 }
  0x19   :  { %2010 = vlog2.f32 %v71_v57  ;;  %v89_v62 = vadd.f32 1.0, %v2007_v58  ;;  %v92_v2 = vmul.f32 -0.5, %v2007_v58  ;;  %v75_v4 = vadd.f32 1.0, %v74_v61 }
  0x1a   :  { %2012 = vlog2.f32 %v80_v59  ;;  %vm2264_vm6 = vcmp.lt.f32.partialorder %v68_v3, 0.0004427343  ;;  %vm2269_vm8 = vcmp.lt.f32.partialorder %v77_v5, 0.0004427343  ;;  %v23_v59 = vld [vmem:[%s2617_s2 + $0x28] sm:$0xff]  ;;  %v2121_v3 = vmov 7  }
  0x1b   :  { %2014 = vlog2.f32 %v89_v62 }
  0x74   :  { %v231_v6 = vpop.permute.xlu0 %230 }
  0x75   :  { %v232_v7 = vsel %vm229_vm2, %v231_v6, %v2159_v0  ;;  %v84_v6 = vadd.f32 1.0, %v83_v63 }
  0x76   :  { %233 = vrot.lane.b32.xlu0 %v232_v7, %s2114_s17  ;;  %v86_v7 = vand.u32 2147483647, %v2005_v56 }
  0x78   :  { %vm2274_vm10 = vcmp.lt.f32.partialorder %v86_v7, 0.0004427343 }
  0x79   :  { %v2170_v8 = vpop.permute.xlu1 %242 }
  0x7a   :  { %247 = vrot.lane.b32.xlu0 %v2159_v0, %s2117_s19 }
  0x7d   :  { %v2172_v9 = vpop.permute.xlu1 %237 }
  0xe8   :  { %v234_v10 = vpop.permute.xlu0 %233 }
  0xe9   :  { %v235_v11 = vsel %vm229_vm2, %v234_v10, %v2159_v0  ;;  %v67_v10 = vmul.f32 %v2001_v53, %v66_v1 }
  0xea   :  { %v245_v12 = vmul.f32 %v2170_v8, %v235_v11  ;;  %v240_v13 = vmul.f32 %v2172_v9, %v235_v11  ;;  %v93_v11 = vadd.f32 1.0, %v92_v2  ;;  %v2311_v2 = vld [vmem:[%s2617_s2 + $0x58] sm:$0xff] }
  0xec   :  { %v248_v14 = vpop.permute.xlu0 %247  ;;  %250 = vrot.lane.b32.xlu1 %v245_v12, %s2118_s20  ;;  %v2009_v12 = vpop.eup %2008 }
  0xed   :  { %v1912_v15 = vpack.i.bf16 %v248_v14, %v240_v13  ;;  %v76_v14 = vmul.f32 %v2003_v54, %v75_v4 }
  0xef   :  { %1913 = vrot.lane.b32.xlu0 %v1912_v15, %s2119_s21  ;;  %v95_v15 = vand.u32 2147483647, %v2007_v58 }
  0xf1   :  { %vm96_vm13 = vcmp.lt.f32.partialorder %v95_v15, 0.0004427343 }
  0xf3   :  { %253 = vperm.xlu0 %1917, %v2190_v17  }
  0xf7   :  { %1920 = vset.pattern.permute.xlu0 %v2121_v3 }
 0x15e   :  { %v251_v19 = vpop.permute.xlu1 %250 }
 0x15f   :  { %265 = vrot.lane.b32.xlu1 %v251_v19, %s2119_s21  ;;  %v2011_v19 = vpop.eup %2010 }
 0x161   :  { %v1914_v21 = vpop.permute.xlu0 %1913 }
 0x162   :  { %v1916_v22 = vunpack.i.h.bf16 %v1914_v21  ;;  %v1915_v23 = vunpack.i.l.bf16 %v1914_v21  ;;  %v64_v21 = vmul.f32 0.6931472, %v2009_v12  ;;  %v2122_v12 = vmov 1  }
 0x163   :  { %257 = vperm.xlu1 %1918, %v2199_v20  }
 0x164   :  { %v1847_v24 = vpack.c.bf16 %v1916_v22, %v1915_v23  ;;  %v85_v23 = vmul.f32 %v2005_v56, %v84_v6 }
 0x166   :  { %1848 = vmatprep.subr.bf16.mxu1 %v1847_v24 }
 0x167   :  { %1850 = vmatpush3.bf16.msra.mxu1 %v1847_v24  ;;  %v2013_v24 = vpop.eup %2012  ;;  %1919 = vset.pattern.permute.xlu1 %v2121_v3 }
 0x172   :  { %v2211_v28 = vpop.permute.xlu0 %253 }
 0x1d1   :  { %v266_v25 = vpop.permute.xlu1 %265 }
 0x1d2   :  { %1757 = vmatprep.subr.mxu1 %v266_v25 }
 0x1d3   :  { %1758 = vmatpush3.msra.mxu1 %v266_v25  ;;  %v73_v25 = vmul.f32 0.6931472, %v2011_v19 }
 0x1d4   :  { %1760 = vmatmul.mubr.msk.f32.vlgmr.msra.gmra.mrb[0].mxu1 %vm270_vm3, %v2205_v26 }
 0x1d5   :  { %1766 = vmatprep.mubr.msk.f32.mxu1 %vm352_vm4, %v2232_v39 }
 0x1e2   :  { %v2209_v27 = vpop.permute.xlu1 %257 }
 0x2a7   :  { %v1761_v29 = vpop.f32.mrb[0].mxu1 }
 0x2a8   :  { %v2214_v30 = vadd.f32 %v1761_v29, %v2209_v27  ;;  %v343_v31 = vpop.f32.mrb[1].mxu1 }
 0x2a9   :  { %v2217_v32 = vadd.f32 %v343_v31, %v2211_v28  ;;  %v70_v31 = vsel %vm2264_vm6, %v67_v10, %v64_v21  ;;  %v32_v10 = vld [vmem:[%s2618_s3 + $0x10] sm:$0xff]  ;;  %vm623_vm6 = vcmask 392192  }
 0x2aa   :  { %v356_v33 = vsel %vm352_vm4, %v2214_v30, 0.0  ;;  %v360_v36 = vmul.f32 %v2214_v30, %v2214_v30 }
 0x2ab   :  { %357 = vadd.xlane.f32.xlu0 %v356_v33  ;;  %v353_v34 = vsel %vm352_vm4, %v2217_v32, 0.0  ;;  %v359_v35 = vmul.f32 %v2217_v32, %v2217_v32  ;;  %v82_v33 = vmul.f32 0.6931472, %v2013_v24 }
 0x2ac   :  { %354 = vadd.xlane.f32.xlu1 %v353_v34  ;;  %v364_v38 = vsel %vm352_vm4, %v360_v36, 0.0  ;;  %v94_v34 = vmul.f32 %v2007_v58, %v93_v11  ;;  %v79_v36 = vsel %vm2269_vm8, %v76_v14, %v73_v25  ;;  %v33_v11 = vld [vmem:[%s2618_s3 + $0x18] sm:$0xff] }
 0x2ad   :  { %v361_v37 = vsel %vm352_vm4, %v359_v35, 0.0  ;;  %v2015_v35 = vpop.eup %2014  ;;  %v88_v43 = vsel %vm2274_vm10, %v85_v23, %v82_v33 }
 0x2ae   :  { %v91_v44 = vmul.f32 0.6931472, %v2015_v35  ;;  %v100_v46 = vsel %vm48_vm11, %v2249_v42, %v88_v43  ;;  %v2123_v35 = vmov 2  }
 0x2af   :  { %362 = vadd.xlane.f32.xlu0 %v361_v37  ;;  %v98_v37 = vsel %vm46_vm7, %v2239_v40, %v70_v31  ;;  %vm896_vm7 = vcmask 64512  }
 0x2b0   :  { %365 = vadd.xlane.f32.xlu1 %v364_v38  ;;  %v99_v38 = vsel %vm47_vm9, %v2244_v41, %v79_v36  ;;  %2016 = vtanh.f32 %v98_v37  ;;  %v97_v47 = vsel %vm96_vm13, %v94_v34, %v91_v44 }
 0x2b1   :  { %2018 = vtanh.f32 %v99_v38  ;;  %v101_v48 = vsel %vm49_vm12, %v2256_v45, %v97_v47 }
 0x2b2   :  { %2020 = vtanh.f32 %v100_v46 }
 0x2b3   :  { %2022 = vtanh.f32 %v101_v48 }
 0x2ba   :  { %v2017_v49 = vpop.eup %2016 }
 0x2bb   :  { %v2019_v50 = vpop.eup %2018  ;;  %v106_v51 = vmul.f32 %v2017_v49, %v2239_v40  ;;  %v24_v40 = vld [vmem:[%s2617_s2 + $0x30] sm:$0xff] }
 0x2bc   :  { %v2021_v52 = vpop.eup %2020  ;;  %v107_v53 = vmul.f32 %v2019_v50, %v2244_v41  ;;  %v25_v41 = vld [vmem:[%s2617_s2 + $0x38] sm:$0xff] }
 0x2bd   :  { %v108_v54 = vmul.f32 %v2021_v52, %v2249_v42  ;;  %v2023_v55 = vpop.eup %2022 }
 0x2be   :  { %v1839_v56 = vpack.c.bf16 %v107_v53, %v106_v51  ;;  %v109_v57 = vmul.f32 %v2023_v55, %v2256_v45 }
 0x2c0   :  { %1840 = vmatprep.subr.bf16.mxu0 %v1839_v56  ;;  %v1843_v58 = vpack.c.bf16 %v109_v57, %v108_v54 }
 0x2c1   :  { %1842 = vmatpush3.bf16.msra.mxu0 %v1839_v56 }
 0x2c2   :  { %1844 = vmatprep.subr.bf16.mxu0 %v1843_v58 }
 0x2c5   :  { %1846 = vmatpush3.bf16.msra.mxu0 %v1843_v58 }
 0x2c8   :  { %1748 = vmatmul.mubr.msk.f32.vlgmr.msra.gmra.mrb[0].mxu0 %vm130_vm5, %v23_v59 }
 0x2c9   :  { %1750 = vmatprep.mubr.msk.f32.mxu0 %vm130_vm5, %v24_v40 }
 0x2cc   :  { %1751 = vmatmul.mubr.msk.f32.gmra.mrb[2].mxu0 %vm130_vm5, %v25_v41 }
 0x338   :  { %v358_v42 = vpop.xlane.xlu0 %357 }
 0x339   :  { %v355_v45 = vpop.xlane.xlu1 %354 }
 0x33c   :  { %v363_v60 = vpop.xlane.xlu0 %362 }
 0x33d   :  { %v368_v61 = vsel %vm367_vm14, %v355_v45, %v363_v60  ;;  %v366_v62 = vpop.xlane.xlu1 %365 }
 0x33e   :  { %v369_v63 = vsel %vm367_vm14, %v358_v42, %v366_v62 }
 0x33f   :  { %v1851_v1 = vpack.c.bf16 %v369_v63, %v368_v61 }
 0x341   :  { %1852 = vmatprep.subr.bf16.mxu1 %v1851_v1 }
 0x342   :  { %1854 = vmatpush3.bf16.msra.mxu1 %v1851_v1 }
 0x345   :  { %1767 = vmatmul.mubr.msk.f32.vlgmr.msra.gmra.mrb[2].mxu1 %vm352_vm4, %v2311_v2 }
 0x346   :  { %1788 = vmatprep.mubr.msk.f32.mxu1 %vm352_vm4, %v2232_v39 }
 0x39b   :  { %v1749_v13 = vpop.f32.mrb[0].mxu0 }
 0x39c   :  { %v209_v14 = vpop.f32.mrb[1].mxu0 }
 0x39f   :  { %v1752_v15 = vpop.f32.mrb[2].mxu0 }
 0x3a0   :  { %v219_v19 = vpop.f32.mrb[3].mxu0 }
 0x418   :  { %v1768_v4 = vpop.f32.mrb[2].mxu1 }
 0x419   :  { %v452_v5 = vmul.f32 %v1768_v4, %v1768_v4  ;;  %v442_v6 = vpop.f32.mrb[3].mxu1 }
 0x41a   :  { %v451_v7 = vmul.f32 %v442_v6, %v442_v6 }
 0x41b   :  { %457 = vrot.lane.b32.xlu1 %v452_v5, %s2116_s18 }
 0x41c   :  { %455 = vrot.lane.b32.xlu0 %v451_v7, %s2116_s18 }
 0x41f   :  { %112 = vperm.xlu1 %1919, %v2190_v17  }
 0x420   :  { %117 = vperm.xlu0 %1920, %v2199_v20  }
 0x423   :  { %122 = vperm.xlu1 %1919, %v32_v10  }
 0x424   :  { %1921 = vset.pattern.permute.xlu0 %v2120_v18 }
 0x425   :  { %465 = vperm.xlu0 %1921, %v442_v6  }
 0x427   :  { %127 = vperm.xlu1 %1919, %v33_v11  }
 0x429   :  { %1924 = vset.pattern.permute.xlu0 %v2122_v12 }
 0x42b   :  { %1922 = vset.pattern.permute.xlu1 %v2120_v18 }
 0x42c   :  { %470 = vperm.xlu1 %1922, %v1768_v4  }
 0x430   :  { %1923 = vset.pattern.permute.xlu1 %v2122_v12 }
 0x431   :  { %492 = vperm.xlu1 %1923, %v2190_v17  }
 0x435   :  { %496 = vperm.xlu1 %1923, %v2199_v20  }
 0x48d   :  { %v458_v21 = vpop.permute.xlu1 %457 }
 0x48e   :  { %v462_v22 = vsub.f32 %v1768_v4, %v458_v21  ;;  %v456_v23 = vpop.permute.xlu0 %455 }
 0x48f   :  { %v461_v24 = vsub.f32 %v442_v6, %v456_v23 }
 0x490   :  { %v476_v25 = vadd.f32 1e-05, %v462_v22 }
 0x491   :  { %v475_v29 = vadd.f32 1e-05, %v461_v24 }
 0x492   :  { %2024 = vrsqrt.f32 %v476_v25 }
 0x493   :  { %2026 = vrsqrt.f32 %v475_v29 }
 0x49c   :  { %v2025_v31 = vpop.eup %2024 }
 0x49d   :  { %v2027_v33 = vpop.eup %2026  ;;  %486 = vperm.xlu0 %1924, %v2025_v31  }
 0x49e   :  { %481 = vperm.xlu1 %1923, %v2027_v33   ;;  %v113_v34 = vpop.permute.xlu1 %112 }
 0x49f   :  { %v118_v36 = vpop.permute.xlu0 %117  ;;  %v2337_v38 = vadd.f32 %v209_v14, %v113_v34 }
 0x4a0   :  { %v2335_v37 = vadd.f32 %v1749_v13, %v118_v36 }
 0x4a1   :  { %1925 = vset.pattern.permute.xlu0 %v2123_v35 }
 0x4a2   :  { %502 = vperm.xlu0 %1925, %v2190_v17   ;;  %1926 = vset.pattern.permute.xlu1 %v2123_v35  ;;  %v123_v43 = vpop.permute.xlu1 %122 }
 0x4a3   :  { %506 = vperm.xlu1 %1926, %v2199_v20   ;;  %v2343_v44 = vadd.f32 %v219_v19, %v123_v43 }
 0x4a4   :  { %v466_v50 = vpop.permute.xlu0 %465 }
 0x4a5   :  { %v473_v53 = vsub.f32 %v2217_v32, %v466_v50 }
 0x4a6   :  { %1928 = vset.pattern.permute.xlu0 %v2120_v18  ;;  %v128_v46 = vpop.permute.xlu1 %127 }
 0x4a7   :  { %1927 = vset.pattern.permute.xlu1 %v2120_v18  ;;  %550 = vperm.xlu0 %1928, %v2335_v37   ;;  %v2345_v47 = vadd.f32 %v1752_v15, %v128_v46 }
 0x4a8   :  { %545 = vperm.xlu1 %1927, %v2337_v38  }
 0x4ab   :  { %v471_v48 = vpop.permute.xlu1 %470 }
 0x4ac   :  { %557 = vperm.xlu1 %1927, %v2343_v44   ;;  %v474_v52 = vsub.f32 %v2214_v30, %v471_v48 }
 0x4b0   :  { %562 = vperm.xlu1 %1927, %v2345_v47   ;;  %v2349_v49 = vpop.permute.xlu1 %492 }
 0x4b4   :  { %v2351_v51 = vpop.permute.xlu1 %496 }
 0x51c   :  { %v487_v54 = vpop.permute.xlu0 %486 }
 0x51d   :  { %v490_v55 = vmul.f32 %v487_v54, %v474_v52  ;;  %v482_v56 = vpop.permute.xlu1 %481 }
 0x51e   :  { %v489_v57 = vmul.f32 %v482_v56, %v473_v53 }
 0x51f   :  { %v500_v59 = vmul.f32 %v2351_v51, %v490_v55 }
 0x520   :  { %v499_v58 = vmul.f32 %v2349_v49, %v489_v57 }
 0x521   :  { %v2357_v40 = vpop.permute.xlu0 %502 }
 0x522   :  { %v509_v41 = vadd.f32 %v2357_v40, %v499_v58  ;;  %v2360_v42 = vpop.permute.xlu1 %506 }
 0x523   :  { %v510_v45 = vadd.f32 %v2360_v42, %v500_v59 }
 0x524   :  { %v513_v60 = vmin.f32 %v509_v41, 20.0  ;;  %vm511_vm0 = vcmp.gt.f32.partialorder %v509_v41, 20.0 }
 0x525   :  { %v514_v30 = vmin.f32 %v510_v45, 20.0  ;;  %vm512_vm5 = vcmp.gt.f32.partialorder %v510_v45, 20.0 }
 0x526   :  { %v515_v61 = vmul.f32 1.442695, %v513_v60  ;;  %v551_v48 = vpop.permute.xlu0 %550 }
 0x527   :  { %v517_v32 = vmul.f32 1.442695, %v514_v30  ;;  %v546_v31 = vpop.permute.xlu1 %545 }
 0x528   :  { %2028 = vpow2.f32 %v515_v61 }
 0x529   :  { %2030 = vpow2.f32 %v517_v32 }
 0x52b   :  { %v558_v33 = vpop.permute.xlu1 %557 }
 0x52f   :  { %v563_v53 = vpop.permute.xlu1 %562 }
 0x532   :  { %v2029_v62 = vpop.eup %2028 }
 0x533   :  { %v2031_v63 = vpop.eup %2030  ;;  %v519_v1 = vadd.f32 1.0, %v2029_v62  ;;  %v522_v4 = vmul.f32 -0.5, %v2029_v62  ;;  %v525_v7 = vand.u32 2147483647, %v2029_v62 }
 0x534   :  { %v528_v3 = vadd.f32 1.0, %v2031_v63  ;;  %v531_v5 = vmul.f32 -0.5, %v2031_v63  ;;  %v534_v11 = vand.u32 2147483647, %v2031_v63 }
 0x535   :  { %2032 = vlog2.f32 %v519_v1  ;;  %v523_v6 = vadd.f32 1.0, %v522_v4  ;;  %vm526_vm15 = vcmp.lt.f32.partialorder %v525_v7, 0.0004427343  ;;  %v2393_v7 = vld [vmem:[%s2617_s2 + $0x10] sm:$0xff] }
 0x536   :  { %2034 = vlog2.f32 %v528_v3  ;;  %v532_v10 = vadd.f32 1.0, %v531_v5  ;;  %vm535_vm1 = vcmp.lt.f32.partialorder %v534_v11, 0.0004427343  ;;  %1781 = vmatprep.mubr.msk.f32.mxu0 %vm623_vm6, %v2393_v7 }
 0x537   :  { %v524_v19 = vmul.f32 %v2029_v62, %v523_v6  ;;  %v2382_v6 = vld [vmem:[%s2615_s0 + $0x8] sm:$0xff] }
 0x538   :  { %v533_v22 = vmul.f32 %v2031_v63, %v532_v10 }
 0x53f   :  { %v2033_v13 = vpop.eup %2032 }
 0x540   :  { %v2035_v14 = vpop.eup %2034  ;;  %v521_v15 = vmul.f32 0.6931472, %v2033_v13 }
 0x541   :  { %v530_v21 = vmul.f32 0.6931472, %v2035_v14 }
 0x542   :  { %v527_v23 = vsel %vm526_vm15, %v524_v19, %v521_v15 }
 0x543   :  { %v537_v24 = vsel %vm511_vm0, %v509_v41, %v527_v23  ;;  %v536_v25 = vsel %vm535_vm1, %v533_v22, %v530_v21 }
 0x544   :  { %2036 = vtanh.f32 %v537_v24  ;;  %v538_v29 = vsel %vm512_vm5, %v510_v45, %v536_v25 }
 0x545   :  { %2038 = vtanh.f32 %v538_v29 }
 0x54e   :  { %v2037_v34 = vpop.eup %2036 }
 0x54f   :  { %v2039_v35 = vpop.eup %2038  ;;  %v541_v36 = vmul.f32 %v2037_v34, %v509_v41  ;;  %v2124_v41 = vmov 3  }
 0x550   :  { %v542_v43 = vmul.f32 %v2039_v35, %v510_v45  ;;  %1954 = vset.pattern.permute.xlu1 %v2124_v41  ;;  %1955 = vset.pattern.permute.xlu0 %v2124_v41 }
 0x551   :  { %v553_v46 = vmul.f32 %v546_v31, %v541_v36  ;;  %v2408_v36 = vld [vmem:[%s2617_s2 + $0x18] sm:$0xff] }
 0x552   :  { %v554_v50 = vmul.f32 %v551_v48, %v542_v43 }
 0x553   :  { %v565_v52 = vadd.f32 %v558_v33, %v553_v46 }
 0x554   :  { %v566_v54 = vadd.f32 %v563_v53, %v554_v50 }
 0x555   :  { %567 = vrot.lane.b32.xlu0 %v565_v52, %s2114_s17 }
 0x556   :  { %570 = vrot.lane.b32.xlu1 %v566_v54, %s2114_s17  ;;  %v1929_v59 = vpack.i.bf16 %v566_v54, %v565_v52 }
 0x5c7   :  { %v568_v55 = vpop.permute.xlu0 %567 }
 0x5c8   :  { %v571_v56 = vpop.permute.xlu1 %570  ;;  %v569_v57 = vsel %vm229_vm2, %v568_v55, %v565_v52 }
 0x5c9   :  { %573 = vrot.lane.b32.xlu0 %v569_v57, %s2114_s17  ;;  %v572_v58 = vsel %vm229_vm2, %v571_v56, %v566_v54 }
 0x5ca   :  { %575 = vrot.lane.b32.xlu1 %v572_v58, %s2114_s17 }
 0x5cd   :  { %1930 = vrot.lane.b32.xlu0 %v1929_v59, %s2117_s19 }
 0x63b   :  { %v574_v45 = vpop.permute.xlu0 %573 }
 0x63c   :  { %v577_v60 = vsel %vm229_vm2, %v574_v45, %v565_v52  ;;  %v576_v30 = vpop.permute.xlu1 %575 }
 0x63d   :  { %v579_v61 = vmul.f32 %v577_v60, %v2172_v9  ;;  %v581_v32 = vmul.f32 %v577_v60, %v2170_v8  ;;  %v578_v62 = vsel %vm229_vm2, %v576_v30, %v566_v54 }
 0x63e   :  { %v580_v63 = vmul.f32 %v578_v62, %v2172_v9  ;;  %v582_v1 = vmul.f32 %v578_v62, %v2170_v8 }
 0x63f   :  { %v1931_v3 = vpop.permute.xlu0 %1930 }
 0x640   :  { %v1934_v4 = vpack.i.bf16 %v582_v1, %v581_v32  ;;  %v1939_v5 = vpack.i.bf16 %v580_v63, %v579_v61 }
 0x642   :  { %1935 = vrot.lane.b32.xlu1 %v1934_v4, %s2118_s20  ;;  %1940 = vrot.lane.b32.xlu0 %v1939_v5, %s2119_s21 }
 0x646   :  { %1945 = vrot.lane.b32.xlu1 %v1931_v3, %s2119_s21 }
 0x64a   :  { %984 = vrot.lane.b32.xlu1 %v2382_v6, %s2114_s17 }
 0x64e   :  { %596 = vperm.xlu1 %1954, %v2190_v17  }
 0x652   :  { %993 = vrot.lane.b32.xlu1 %v2382_v6, %s2117_s19 }
 0x653   :  { %1961 = vset.pattern.permute.xlu1 %v2120_v18 }
 0x6b4   :  { %v1936_v10 = vpop.permute.xlu1 %1935  ;;  %v1941_v11 = vpop.permute.xlu0 %1940 }
 0x6b5   :  { %v1943_v13 = vunpack.i.h.bf16 %v1941_v11  ;;  %v1942_v14 = vunpack.i.l.bf16 %v1941_v11  ;;  %1950 = vrot.lane.b32.xlu0 %v1936_v10, %s2119_s21 }
 0x6b7   :  { %v1855_v15 = vpack.c.bf16 %v1943_v13, %v1942_v14  ;;  %v2445_v13 = vld [vmem:[%s2617_s2 + $0x40] sm:$0xff] }
 0x6b8   :  { %v1946_v17 = vpop.permute.xlu1 %1945 }
 0x6b9   :  { %v1948_v19 = vunpack.i.h.bf16 %v1946_v17  ;;  %v1947_v21 = vunpack.i.l.bf16 %v1946_v17  ;;  %1856 = vmatprep.subr.bf16.mxu0 %v1855_v15 }
 0x6ba   :  { %1858 = vmatpush3.bf16.msra.mxu0 %v1855_v15  ;;  %v2455_v15 = vld [vmem:[%s2617_s2 + $0x48] sm:$0xff] }
 0x6bb   :  { %v1859_v22 = vpack.c.bf16 %v1948_v19, %v1947_v21 }
 0x6bc   :  { %v985_v23 = vpop.permute.xlu1 %984 }
 0x6bd   :  { %1860 = vmatprep.subr.bf16.mxu0 %v1859_v22  ;;  %v986_v24 = vsel %vm229_vm2, %v985_v23, %v2382_v6 }
 0x6be   :  { %987 = vrot.lane.b32.xlu0 %v986_v24, %s2114_s17  ;;  %1862 = vmatpush3.bf16.msra.mxu0 %v1859_v22 }
 0x6c2   :  { %600 = vperm.xlu0 %1955, %v2199_v20  }
 0x6c6   :  { %1962 = vset.pattern.permute.xlu0 %v2122_v12 }
 0x6cd   :  { %v2418_v48 = vpop.permute.xlu1 %596 }
 0x6d1   :  { %v994_v45 = vpop.permute.xlu1 %993 }
 0x727   :  { %v1951_v25 = vpop.permute.xlu0 %1950 }
 0x728   :  { %v1953_v29 = vunpack.i.h.bf16 %v1951_v25  ;;  %v1952_v31 = vunpack.i.l.bf16 %v1951_v25 }
 0x72a   :  { %v1863_v33 = vpack.c.bf16 %v1953_v29, %v1952_v31 }
 0x72c   :  { %1864 = vmatprep.subr.bf16.mxu0 %v1863_v33 }
 0x72d   :  { %1866 = vmatpush3.bf16.msra.mxu0 %v1863_v33 }
 0x730   :  { %v988_v34 = vpop.permute.xlu0 %987  ;;  %1782 = vmatmul.mubr.msk.f32.vlgmr.msra.gmra.mrb[4].mxu0 %vm623_vm6, %v2408_v36 }
 0x731   :  { %v989_v35 = vsel %vm229_vm2, %v988_v34, %v2382_v6  ;;  %1809 = vmatprep.mubr.msk.f32.mxu0 %vm352_vm4, %v2232_v39 }
 0x732   :  { %v991_v43 = vmul.f32 %v989_v35, %v2170_v8  ;;  %v990_v41 = vmul.f32 %v989_v35, %v2172_v9 }
 0x734   :  { %996 = vrot.lane.b32.xlu1 %v991_v43, %s2118_s20  ;;  %v1956_v60 = vpack.i.bf16 %v994_v45, %v990_v41 }
 0x741   :  { %v2416_v20 = vpop.permute.xlu0 %600 }
 0x7a6   :  { %v997_v30 = vpop.permute.xlu1 %996 }
 0x803   :  { %v1783_v46 = vpop.f32.mrb[4].mxu0 }
 0x804   :  { %v2421_v50 = vadd.f32 %v1783_v46, %v2416_v20  ;;  %v696_v52 = vpop.f32.mrb[5].mxu0 }
 0x805   :  { %v2424_v53 = vadd.f32 %v696_v52, %v2418_v48 }
 0x806   :  { %v708_v54 = vsel %vm352_vm4, %v2421_v50, 0.0  ;;  %v712_v56 = vmul.f32 %v2421_v50, %v2421_v50 }
 0x807   :  { %709 = vadd.xlane.f32.xlu1 %v708_v54  ;;  %v705_v55 = vsel %vm352_vm4, %v2424_v53, 0.0  ;;  %v711_v58 = vmul.f32 %v2424_v53, %v2424_v53 }
 0x808   :  { %706 = vadd.xlane.f32.xlu0 %v705_v55  ;;  %v716_v57 = vsel %vm352_vm4, %v712_v56, 0.0 }
 0x809   :  { %v713_v59 = vsel %vm352_vm4, %v711_v58, 0.0 }
 0x80c   :  { %717 = vadd.xlane.f32.xlu0 %v716_v57 }
 0x810   :  { %714 = vadd.xlane.f32.xlu0 %v713_v59 }
 0x818   :  { %1957 = vrot.lane.b32.xlu1 %v1956_v60, %s2119_s21 }
 0x826   :  { %1003 = vrot.lane.b32.xlu0 %v997_v30, %s2119_s21 }
 0x894   :  { %v710_v32 = vpop.xlane.xlu1 %709 }
 0x895   :  { %v707_v61 = vpop.xlane.xlu0 %706 }
 0x898   :  { %v1958_v1 = vpop.permute.xlu1 %1957 }
 0x899   :  { %v718_v62 = vpop.xlane.xlu0 %717  ;;  %v1960_v10 = vunpack.i.h.bf16 %v1958_v1  ;;  %v1959_v11 = vunpack.i.l.bf16 %v1958_v1 }
 0x89a   :  { %v720_v3 = vsel %vm367_vm14, %v710_v32, %v718_v62 }
 0x89b   :  { %v1871_v14 = vpack.c.bf16 %v1960_v10, %v1959_v11 }
 0x89d   :  { %v715_v63 = vpop.xlane.xlu0 %714 }
 0x89e   :  { %v719_v4 = vsel %vm367_vm14, %v707_v61, %v715_v63 }
 0x89f   :  { %v1867_v5 = vpack.c.bf16 %v720_v3, %v719_v4 }
 0x8a1   :  { %1868 = vmatprep.subr.bf16.mxu1 %v1867_v5  ;;  %v1004_v17 = vpop.permute.xlu0 %1003 }
 0x8a2   :  { %1870 = vmatpush3.bf16.msra.mxu1 %v1867_v5 }
 0x8a3   :  { %1791 = vmatprep.subr.mxu1 %v2159_v0 }
 0x8a5   :  { %1789 = vmatmul.mubr.msk.f32.vlgmr.msra.gmra.mrb[4].mxu1 %vm352_vm4, %v2311_v2 }
 0x8a6   :  { %1792 = vmatpush3.msra.mxu1 %v2159_v0  ;;  %1793 = vmatprep.mubr.msk.f32.mxu1 %vm896_vm7, %v2445_v13 }
 0x8a7   :  { %1872 = vmatprep.subr.bf16.mxu1 %v1871_v14 }
 0x8a9   :  { %1794 = vmatmul.mubr.msk.f32.vlgmr.msra.gmra.mrb[6].mxu1 %vm896_vm7, %v2455_v15 }
 0x8aa   :  { %1874 = vmatpush3.bf16.msra.mxu1 %v1871_v14  ;;  %1802 = vmatprep.mubr.msk.f32.mxu1 %vm270_vm3, %v2183_v16 }
 0x8ab   :  { %1800 = vmatprep.subr.mxu1 %v1004_v17 }
 0x8ae   :  { %1801 = vmatpush3.msra.mxu1 %v1004_v17 }
 0x8af   :  { %1803 = vmatmul.mubr.msk.f32.vlgmr.msra.gmra.mrb[8].mxu1 %vm270_vm3, %v2205_v26 }
 0x8b0   :  { %1831 = vmatprep.mubr.msk.f32.mxu1 %vm352_vm4, %v2232_v39 }
 0x978   :  { %v2465_v0 = vpop.f32.mrb[4].mxu1 }
 0x979   :  { %v2467_v19 = vpop.f32.mrb[5].mxu1 }
 0x97c   :  { %v2469_v21 = vpop.f32.mrb[6].mxu1 }
 0x97d   :  { %v2471_v22 = vpop.f32.mrb[7].mxu1 }
 0x982   :  { %v1804_v23 = vpop.f32.mrb[8].mxu1 }
 0x983   :  { %v1080_v24 = vadd.f32 %v1804_v23, %v2209_v27  ;;  %v1074_v16 = vpop.f32.mrb[9].mxu1 }
 0x984   :  { %v1075_v25 = vadd.f32 %v1074_v16, %v2211_v28 }
 0x985   :  { %v1086_v29 = vsel %vm352_vm4, %v1080_v24, 0.0  ;;  %v1090_v26 = vmul.f32 %v1080_v24, %v1080_v24 }
 0x986   :  { %1087 = vadd.xlane.f32.xlu0 %v1086_v29  ;;  %v1083_v39 = vsel %vm352_vm4, %v1075_v25, 0.0  ;;  %v1089_v31 = vmul.f32 %v1075_v25, %v1075_v25 }
 0x987   :  { %1084 = vadd.xlane.f32.xlu1 %v1083_v39  ;;  %v1094_v33 = vsel %vm352_vm4, %v1090_v26, 0.0 }
 0x988   :  { %v1091_v34 = vsel %vm352_vm4, %v1089_v31, 0.0 }
 0x98a   :  { %1095 = vadd.xlane.f32.xlu0 %v1094_v33 }
 0x98b   :  { %1092 = vadd.xlane.f32.xlu1 %v1091_v34 }
 0xa13   :  { %v1088_v35 = vpop.xlane.xlu0 %1087 }
 0xa14   :  { %v1085_v43 = vpop.xlane.xlu1 %1084 }
 0xa17   :  { %v1096_v27 = vpop.xlane.xlu0 %1095 }
 0xa18   :  { %v1098_v46 = vsel %vm367_vm14, %v1088_v35, %v1096_v27  ;;  %v1093_v28 = vpop.xlane.xlu1 %1092 }
 0xa19   :  { %v1097_v52 = vsel %vm367_vm14, %v1085_v43, %v1093_v28 }
 0xa1a   :  { %v1875_v54 = vpack.c.bf16 %v1098_v46, %v1097_v52 }
 0xa1c   :  { %1876 = vmatprep.subr.bf16.mxu0 %v1875_v54 }
 0xa1d   :  { %1878 = vmatpush3.bf16.msra.mxu0 %v1875_v54 }
 0xa20   :  { %1810 = vmatmul.mubr.msk.f32.vlgmr.msra.gmra.mrb[6].mxu0 %vm352_vm4, %v2311_v2 }
 0xa21   :  { %1824 = vmatprep.mubr.msk.f32.mxu0 %vm623_vm6, %v2393_v7 }
 0xaf3   :  { %v1811_v55 = vpop.f32.mrb[6].mxu0 }
 0xaf4   :  { %v1175_v56 = vmul.f32 %v1811_v55, %v1811_v55  ;;  %v1165_v57 = vpop.f32.mrb[7].mxu0 }
 0xaf5   :  { %v1174_v58 = vmul.f32 %v1165_v57, %v1165_v57 }
 0xaf6   :  { %1180 = vrot.lane.b32.xlu0 %v1175_v56, %s2116_s18 }
 0xaf7   :  { %1178 = vrot.lane.b32.xlu1 %v1174_v58, %s2116_s18 }
 0xafb   :  { %1188 = vperm.xlu1 %1961, %v1165_v57  }
 0xaff   :  { %1193 = vperm.xlu1 %1961, %v1811_v55  }
 0xb03   :  { %1963 = vset.pattern.permute.xlu1 %v2122_v12 }
 0xb68   :  { %v1181_v59 = vpop.permute.xlu0 %1180 }
 0xb69   :  { %v1185_v41 = vsub.f32 %v1811_v55, %v1181_v59  ;;  %v1179_v45 = vpop.permute.xlu1 %1178 }
 0xb6a   :  { %v1184_v60 = vsub.f32 %v1165_v57, %v1179_v45 }
 0xb6b   :  { %v1199_v30 = vadd.f32 1e-05, %v1185_v41 }
 0xb6c   :  { %v1198_v61 = vadd.f32 1e-05, %v1184_v60 }
 0xb6d   :  { %2040 = vrsqrt.f32 %v1199_v30 }
 0xb6e   :  { %2042 = vrsqrt.f32 %v1198_v61 }
 0xb77   :  { %v2041_v7 = vpop.eup %2040 }
 0xb78   :  { %v2043_v32 = vpop.eup %2042  ;;  %1209 = vperm.xlu1 %1963, %v2041_v7  }
 0xb79   :  { %1204 = vperm.xlu0 %1962, %v2043_v32  }
 0xb7a   :  { %v1189_v62 = vpop.permute.xlu1 %1188 }
 0xb7b   :  { %v1196_v3 = vsub.f32 %v1075_v25, %v1189_v62 }
 0xb7c   :  { %1251 = vperm.xlu1 %1963, %v2337_v38  }
 0xb7d   :  { %1255 = vperm.xlu0 %1962, %v2335_v37  }
 0xb7e   :  { %v1194_v63 = vpop.permute.xlu1 %1193 }
 0xb7f   :  { %v1197_v1 = vsub.f32 %v1080_v24, %v1194_v63 }
 0xb80   :  { %1261 = vperm.xlu1 %1963, %v2343_v44  }
 0xb81   :  { %1265 = vperm.xlu0 %1962, %v2345_v47  }
 0xb84   :  { %1990 = vset.pattern.permute.xlu1 %v2120_v18 }
 0xb85   :  { %1989 = vset.pattern.permute.xlu0 %v2120_v18 }
 0xbf7   :  { %v1210_v4 = vpop.permute.xlu1 %1209 }
 0xbf8   :  { %v1213_v5 = vmul.f32 %v1210_v4, %v1197_v1  ;;  %v1205_v10 = vpop.permute.xlu0 %1204 }
 0xbf9   :  { %v1212_v11 = vmul.f32 %v1205_v10, %v1196_v3 }
 0xbfa   :  { %v1215_v38 = vmul.f32 %v1213_v5, %v2351_v51 }
 0xbfb   :  { %v1214_v37 = vmul.f32 %v1212_v11, %v2349_v49  ;;  %v1252_v56 = vpop.permute.xlu1 %1251 }
 0xbfc   :  { %v1217_v44 = vadd.f32 %v1215_v38, %v2360_v42  ;;  %v1256_v55 = vpop.permute.xlu0 %1255 }
 0xbfd   :  { %v1216_v47 = vadd.f32 %v1214_v37, %v2357_v40 }
 0xbfe   :  { %v1221_v14 = vmin.f32 %v1217_v44, 20.0  ;;  %vm1219_vm8 = vcmp.gt.f32.partialorder %v1217_v44, 20.0 }
 0xbff   :  { %v1220_v17 = vmin.f32 %v1216_v47, 20.0  ;;  %vm1218_vm10 = vcmp.gt.f32.partialorder %v1216_v47, 20.0  ;;  %v1262_v61 = vpop.permute.xlu1 %1261 }
 0xc00   :  { %v1224_v23 = vmul.f32 1.442695, %v1221_v14  ;;  %v1266_v30 = vpop.permute.xlu0 %1265 }
 0xc01   :  { %v1222_v18 = vmul.f32 1.442695, %v1220_v17 }
 0xc02   :  { %2044 = vpow2.f32 %v1224_v23 }
 0xc03   :  { %2046 = vpow2.f32 %v1222_v18 }
 0xc0c   :  { %v2045_v24 = vpop.eup %2044 }
 0xc0d   :  { %v2047_v16 = vpop.eup %2046  ;;  %v1235_v25 = vadd.f32 1.0, %v2045_v24  ;;  %v1238_v26 = vmul.f32 -0.5, %v2045_v24  ;;  %v1241_v49 = vand.u32 2147483647, %v2045_v24 }
 0xc0e   :  { %v1226_v29 = vadd.f32 1.0, %v2047_v16  ;;  %v1229_v51 = vmul.f32 -0.5, %v2047_v16  ;;  %v1232_v42 = vand.u32 2147483647, %v2047_v16 }
 0xc0f   :  { %2048 = vlog2.f32 %v1235_v25  ;;  %v1239_v39 = vadd.f32 1.0, %v1238_v26  ;;  %vm1242_vm3 = vcmp.lt.f32.partialorder %v1241_v49, 0.0004427343 }
 0xc10   :  { %2050 = vlog2.f32 %v1226_v29  ;;  %v1230_v31 = vadd.f32 1.0, %v1229_v51  ;;  %vm1233_vm9 = vcmp.lt.f32.partialorder %v1232_v42, 0.0004427343 }
 0xc11   :  { %v1240_v35 = vmul.f32 %v2045_v24, %v1239_v39 }
 0xc12   :  { %v1231_v27 = vmul.f32 %v2047_v16, %v1230_v31 }
 0xc19   :  { %v2049_v33 = vpop.eup %2048 }
 0xc1a   :  { %v2051_v40 = vpop.eup %2050  ;;  %v1237_v34 = vmul.f32 0.6931472, %v2049_v33 }
 0xc1b   :  { %v1228_v43 = vmul.f32 0.6931472, %v2051_v40 }
 0xc1c   :  { %v1243_v46 = vsel %vm1242_vm3, %v1240_v35, %v1237_v34 }
 0xc1d   :  { %v1245_v28 = vsel %vm1219_vm8, %v1217_v44, %v1243_v46  ;;  %v1234_v52 = vsel %vm1233_vm9, %v1231_v27, %v1228_v43 }
 0xc1e   :  { %2052 = vtanh.f32 %v1245_v28  ;;  %v1244_v54 = vsel %vm1218_vm10, %v1216_v47, %v1234_v52  ;;  %v796_v52 = vmul.f32 %v2467_v19, %v2467_v19 }
 0xc1f   :  { %2054 = vtanh.f32 %v1244_v54  ;;  %v797_v54 = vmul.f32 %v2465_v0, %v2465_v0 }
 0xc28   :  { %v2053_v57 = vpop.eup %2052 }
 0xc29   :  { %v2055_v58 = vpop.eup %2054  ;;  %v1249_v59 = vmul.f32 %v2053_v57, %v1217_v44 }
 0xc2a   :  { %v1248_v41 = vmul.f32 %v2055_v58, %v1216_v47 }
 0xc2b   :  { %v1259_v45 = vmul.f32 %v1256_v55, %v1249_v59 }
 0xc2c   :  { %v1258_v60 = vmul.f32 %v1252_v56, %v1248_v41 }
 0xc2d   :  { %v1269_v7 = vadd.f32 %v1266_v30, %v1259_v45 }
 0xc2e   :  { %v1268_v32 = vadd.f32 %v1262_v61, %v1258_v60 }
 0xc2f   :  { %1273 = vrot.lane.b32.xlu0 %v1269_v7, %s2114_s17 }
 0xc30   :  { %1270 = vrot.lane.b32.xlu1 %v1268_v32, %s2114_s17  ;;  %v1964_v4 = vpack.i.bf16 %v1269_v7, %v1268_v32 }
 0xca1   :  { %v1274_v62 = vpop.permute.xlu0 %1273 }
 0xca2   :  { %v1271_v63 = vpop.permute.xlu1 %1270  ;;  %v1275_v1 = vsel %vm229_vm2, %v1274_v62, %v1269_v7 }
 0xca3   :  { %1278 = vrot.lane.b32.xlu0 %v1275_v1, %s2114_s17  ;;  %v1272_v3 = vsel %vm229_vm2, %v1271_v63, %v1268_v32 }
 0xca4   :  { %1276 = vrot.lane.b32.xlu1 %v1272_v3, %s2114_s17  ;;  %v2088_v3 = vld [vmem:[%s2618_s3] sm:$0xff] }
 0xca8   :  { %1965 = vrot.lane.b32.xlu1 %v1964_v4, %s2117_s19  ;;  %v2089_v4 = vld [vmem:[%s2618_s3 + $0x8] sm:$0xff]  ;;  %s2128_s3 = smov [#allocation2]  }
 0xd15   :  { %v1279_v5 = vpop.permute.xlu0 %1278 }
 0xd16   :  { %v1281_v10 = vsel %vm229_vm2, %v1279_v5, %v1269_v7  ;;  %v1277_v11 = vpop.permute.xlu1 %1276 }
 0xd17   :  { %v1283_v38 = vmul.f32 %v1281_v10, %v2172_v9  ;;  %v1285_v37 = vmul.f32 %v1281_v10, %v2170_v8  ;;  %v1280_v44 = vsel %vm229_vm2, %v1277_v11, %v1268_v32 }
 0xd18   :  { %v1282_v47 = vmul.f32 %v1280_v44, %v2172_v9  ;;  %v1284_v14 = vmul.f32 %v1280_v44, %v2170_v8 }
 0xd1a   :  { %v1966_v17 = vpop.permute.xlu1 %1965  ;;  %v1969_v23 = vpack.i.bf16 %v1285_v37, %v1284_v14  ;;  %v1974_v18 = vpack.i.bf16 %v1283_v38, %v1282_v47 }
 0xd1c   :  { %1970 = vrot.lane.b32.xlu0 %v1969_v23, %s2118_s20  ;;  %1975 = vrot.lane.b32.xlu1 %v1974_v18, %s2119_s21 }
 0xd20   :  { %1980 = vrot.lane.b32.xlu0 %v1966_v17, %s2119_s21  ;;  %v2127_v17 = vmov 6  }
 0xd8e   :  { %v1971_v24 = vpop.permute.xlu0 %1970  ;;  %v1976_v16 = vpop.permute.xlu1 %1975 }
 0xd8f   :  { %v1978_v25 = vunpack.i.h.bf16 %v1976_v16  ;;  %v1977_v29 = vunpack.i.l.bf16 %v1976_v16  ;;  %1985 = vrot.lane.b32.xlu1 %v1971_v24, %s2119_s21 }
 0xd91   :  { %v1879_v26 = vpack.c.bf16 %v1978_v25, %v1977_v29 }
 0xd92   :  { %v1981_v51 = vpop.permute.xlu0 %1980 }
 0xd93   :  { %v1983_v39 = vunpack.i.h.bf16 %v1981_v51  ;;  %v1982_v49 = vunpack.i.l.bf16 %v1981_v51  ;;  %1880 = vmatprep.subr.bf16.mxu0 %v1879_v26 }
 0xd94   :  { %1882 = vmatpush3.bf16.msra.mxu0 %v1879_v26 }
 0xd95   :  { %v1883_v8 = vpack.c.bf16 %v1983_v39, %v1982_v49 }
 0xd97   :  { %1884 = vmatprep.subr.bf16.mxu0 %v1883_v8 }
 0xd98   :  { %1886 = vmatpush3.bf16.msra.mxu0 %v1883_v8 }
 0xe01   :  { %v1986_v9 = vpop.permute.xlu1 %1985 }
 0xe02   :  { %v1988_v31 = vunpack.i.h.bf16 %v1986_v9  ;;  %v1987_v42 = vunpack.i.l.bf16 %v1986_v9 }
 0xe04   :  { %v1887_v33 = vpack.c.bf16 %v1988_v31, %v1987_v42 }
 0xe06   :  { %1888 = vmatprep.subr.bf16.mxu0 %v1887_v33 }
 0xe07   :  { %1890 = vmatpush3.bf16.msra.mxu0 %v1887_v33 }
 0xe0a   :  { %1825 = vmatmul.mubr.msk.f32.vlgmr.msra.gmra.mrb[8].mxu0 %vm623_vm6, %v2408_v36 }
 0xedd   :  { %v1826_v40 = vpop.f32.mrb[8].mxu0 }
 0xede   :  { %v2518_v34 = vadd.f32 %v1826_v40, %v2416_v20  ;;  %v1384_v35 = vpop.f32.mrb[9].mxu0 }
 0xedf   :  { %v2521_v43 = vadd.f32 %v1384_v35, %v2418_v48 }
 0xee0   :  { %v1396_v27 = vsel %vm352_vm4, %v2518_v34, 0.0  ;;  %v1400_v20 = vmul.f32 %v2518_v34, %v2518_v34 }
 0xee1   :  { %1397 = vadd.xlane.f32.xlu1 %v1396_v27  ;;  %v1393_v46 = vsel %vm352_vm4, %v2521_v43, 0.0  ;;  %v1399_v28 = vmul.f32 %v2521_v43, %v2521_v43 }
 0xee2   :  { %1394 = vadd.xlane.f32.xlu0 %v1393_v46  ;;  %v1404_v48 = vsel %vm352_vm4, %v1400_v20, 0.0 }
 0xee3   :  { %v1401_v36 = vsel %vm352_vm4, %v1399_v28, 0.0 }
 0xee6   :  { %1402 = vadd.xlane.f32.xlu0 %v1401_v36 }
 0xeea   :  { %1405 = vadd.xlane.f32.xlu0 %v1404_v48 }
 0xef2   :  { %800 = vrot.lane.b32.xlu1 %v796_v52, %s2116_s18 }
 0xf00   :  { %802 = vrot.lane.b32.xlu0 %v797_v54, %s2116_s18 }
 0xf04   :  { %810 = vperm.xlu0 %1989, %v2467_v19  }
 0xf6e   :  { %v1398_v57 = vpop.xlane.xlu1 %1397 }
 0xf6f   :  { %v1395_v55 = vpop.xlane.xlu0 %1394 }
 0xf72   :  { %v801_v7 = vpop.permute.xlu1 %800 }
 0xf73   :  { %v1403_v56 = vpop.xlane.xlu0 %1402  ;;  %v806_v63 = vsub.f32 %v2467_v19, %v801_v7  ;;  %v2126_v19 = vmov 5  }
 0xf74   :  { %v1407_v59 = vsel %vm367_vm14, %v1395_v55, %v1403_v56 }
 0xf77   :  { %v1406_v58 = vpop.xlane.xlu0 %1405 }
 0xf78   :  { %v1408_v41 = vsel %vm367_vm14, %v1398_v57, %v1406_v58 }
 0xf79   :  { %v1891_v45 = vpack.c.bf16 %v1408_v41, %v1407_v59 }
 0xf7b   :  { %1892 = vmatprep.subr.bf16.mxu1 %v1891_v45  ;;  %v803_v60 = vpop.permute.xlu0 %802 }
 0xf7c   :  { %1894 = vmatpush3.bf16.msra.mxu1 %v1891_v45  ;;  %v807_v30 = vsub.f32 %v2465_v0, %v803_v60 }
 0xf7d   :  { %1834 = vmatprep.subr.mxu1 %v2382_v6 }
 0xf7e   :  { %v821_v61 = vadd.f32 1e-05, %v807_v30 }
 0xf7f   :  { %1832 = vmatmul.mubr.msk.f32.vlgmr.msra.gmra.mrb[10].mxu1 %vm352_vm4, %v2311_v2 }
 0xf80   :  { %1835 = vmatpush3.msra.mxu1 %v2382_v6  ;;  %1836 = vmatprep.mubr.msk.f32.mxu1 %vm896_vm7, %v2445_v13  ;;  %2056 = vrsqrt.f32 %v821_v61  ;;  %v820_v13 = vadd.f32 1e-05, %v806_v63 }
 0xf82   :  { %2058 = vrsqrt.f32 %v820_v13 }
 0xf83   :  { %1837 = vmatmul.mubr.msk.f32.vlgmr.msra.gmra.mrb[12].mxu1 %vm896_vm7, %v2455_v15  ;;  %v2125_v15 = vmov 4   ;;  %v811_v24 = vpop.permute.xlu0 %810 }
 0xf84   :  { %v818_v57 = vsub.f32 %v2424_v53, %v811_v24 }
 0xf8a   :  { %v2057_v6 = vpop.eup %2056 }
 0xf8c   :  { %v2059_v5 = vpop.eup %2058 }
0x1052   :  { %v1833_v32 = vpop.f32.mrb[10].mxu1 }
0x1053   :  { %1503 = vperm.xlu0 %1989, %v1833_v32   ;;  %v1475_v62 = vpop.f32.mrb[11].mxu1  ;;  %v1485_v1 = vmul.f32 %v1833_v32, %v1833_v32 }
0x1054   :  { %v1484_v2 = vmul.f32 %v1475_v62, %v1475_v62 }
0x1056   :  { %1488 = vrot.lane.b32.xlu1 %v1484_v2, %s2116_s18  ;;  %v2565_v23 = vpop.f32.mrb[12].mxu1 }
0x1057   :  { %1992 = vset.pattern.permute.xlu0 %v2122_v12 }
0x1058   :  { %831 = vperm.xlu0 %1992, %v2057_v6  }
0x105a   :  { %1490 = vrot.lane.b32.xlu1 %v1485_v1, %s2116_s18  ;;  %s1645_s18 = sshll.u32 %s2128_s3, 4  ;;  %s1646_s18 = int_to_ptr.vmem [resolvable:$true] %s1645_s18 }
0x105b   :  { %s2090_s21 = scalar_lea.vmem %s1646_s18, 512  ;;  %p2095_p1 = scmp.lt.s32.totalorder %s1646_s18, %s1646_s18 }
0x105c   :  { %1993 = vset.pattern.permute.xlu0 %v2125_v15  ;;  %p2091_p0 = scmp.ne.s32.totalorder %s1646_s18, %s2090_s21  ;;  %p2096_p2 = scmp.lt.s32.totalorder %s2090_s21, %s2090_s21 }
0x105d   :  { %837 = vperm.xlu0 %1993, %v2088_v3  }
0x105e   :  { %815 = vperm.xlu1 %1990, %v2465_v0   ;;  %p2097_p3 = por %p2096_p2, %p2095_p1 }
0x1060   :  { %p2098_p4 = pnand %p2097_p3, %p2091_p0 }
0x1061   :  { %1997 = vset.pattern.permute.xlu0 %v2126_v19 }
0x1062   :  { %1498 = vperm.xlu1 %1990, %v1475_v62   ;;  %851 = vperm.xlu0 %1997, %v2089_v4  }
0x1066   :  { %1991 = vset.pattern.permute.xlu1 %v2122_v12  ;;  %1999 = vset.pattern.permute.xlu0 %v2122_v12 }
0x1067   :  { %826 = vperm.xlu1 %1991, %v2059_v5  }
0x106b   :  { %1994 = vset.pattern.permute.xlu1 %v2125_v15 }
0x106c   :  { %841 = vperm.xlu1 %1994, %v2089_v4  }
0x1070   :  { %1995 = vset.pattern.permute.xlu1 %v2122_v12  ;;  %v2567_v12 = vpop.f32.mrb[13].mxu1 }
0x10c8   :  { %v1489_v10 = vpop.permute.xlu1 %1488 }
0x10c9   :  { %v1494_v11 = vsub.f32 %v1475_v62, %v1489_v10 }
0x10cb   :  { %v1508_v44 = vadd.f32 1e-05, %v1494_v11 }
0x10cc   :  { %v1491_v0 = vpop.permute.xlu1 %1490 }
0x10cd   :  { %v1495_v38 = vsub.f32 %v1833_v32, %v1491_v0 }
0x10cf   :  { %v1509_v37 = vadd.f32 1e-05, %v1495_v38 }
0x10d1   :  { %2060 = vrsqrt.f32 %v1509_v37 }
0x10d2   :  { %2062 = vrsqrt.f32 %v1508_v44  ;;  %v1504_v16 = vpop.permute.xlu0 %1503 }
0x10d7   :  { %v832_v29 = vpop.permute.xlu0 %831 }
0x10db   :  { %v2061_v47 = vpop.eup %2060 }
0x10dc   :  { %1519 = vperm.xlu1 %1995, %v2061_v47   ;;  %v2063_v14 = vpop.eup %2062  ;;  %v838_v39 = vpop.permute.xlu0 %837 }
0x10dd   :  { %v816_v18 = vpop.permute.xlu1 %815 }
0x10de   :  { %v819_v51 = vsub.f32 %v2421_v50, %v816_v18  ;;  %v1507_v50 = vsub.f32 %v2518_v34, %v1504_v16 }
0x10e0   :  { %1514 = vperm.xlu1 %1995, %v2063_v14   ;;  %v835_v8 = vmul.f32 %v832_v29, %v819_v51 }
0x10e1   :  { %v1499_v25 = vpop.permute.xlu1 %1498  ;;  %v852_v31 = vpop.permute.xlu0 %851 }
0x10e2   :  { %v1506_v58 = vsub.f32 %v2521_v43, %v1499_v25 }
0x10e4   :  { %1996 = vset.pattern.permute.xlu1 %v2126_v19 }
0x10e5   :  { %847 = vperm.xlu1 %1996, %v2088_v3  }
0x10e6   :  { %v827_v26 = vpop.permute.xlu1 %826 }
0x10e7   :  { %v834_v45 = vmul.f32 %v827_v26, %v818_v57 }
0x10e9   :  { %1998 = vset.pattern.permute.xlu1 %v2127_v17  ;;  %v844_v32 = vmul.f32 %v838_v39, %v834_v45 }
0x10ea   :  { %889 = vperm.xlu1 %1998, %v2088_v3  }
0x10eb   :  { %v842_v49 = vpop.permute.xlu1 %841 }
0x10ec   :  { %v845_v9 = vmul.f32 %v842_v49, %v835_v8 }
0x10ee   :  { %893 = vperm.xlu1 %1998, %v2089_v4   ;;  %v855_v42 = vadd.f32 %v852_v31, %v845_v9 }
0x10f0   :  { %v859_v33 = vmin.f32 %v855_v42, 20.0  ;;  %vm857_vm11 = vcmp.gt.f32.partialorder %v855_v42, 20.0 }
0x10f2   :  { %v862_v40 = vmul.f32 1.442695, %v859_v33 }
0x10f4   :  { %2064 = vpow2.f32 %v862_v40 }
0x10fe   :  { %v2065_v35 = vpop.eup %2064 }
0x10ff   :  { %v873_v27 = vadd.f32 1.0, %v2065_v35  ;;  %v876_v46 = vmul.f32 -0.5, %v2065_v35  ;;  %v879_v20 = vand.u32 2147483647, %v2065_v35 }
0x1101   :  { %2066 = vlog2.f32 %v873_v27  ;;  %v877_v36 = vadd.f32 1.0, %v876_v46  ;;  %vm880_vm2 = vcmp.lt.f32.partialorder %v879_v20, 0.0004427343 }
0x1103   :  { %v878_v52 = vmul.f32 %v2065_v35, %v877_v36 }
0x110b   :  { %v2067_v28 = vpop.eup %2066 }
0x110c   :  { %v875_v48 = vmul.f32 0.6931472, %v2067_v28 }
0x110e   :  { %v881_v54 = vsel %vm880_vm2, %v878_v52, %v875_v48 }
0x110f   :  { %v883_v59 = vsel %vm857_vm11, %v855_v42, %v881_v54 }
0x1110   :  { %2068 = vtanh.f32 %v883_v59 }
0x111a   :  { %v2069_v3 = vpop.eup %2068 }
0x111b   :  { %v887_v4 = vmul.f32 %v2069_v3, %v855_v42 }
0x115b   :  { %v1520_v55 = vpop.permute.xlu1 %1519 }
0x115c   :  { %v1523_v56 = vmul.f32 %v1520_v55, %v1507_v50 }
0x115e   :  { %v1525_v41 = vmul.f32 %v1523_v56, %v842_v49 }
0x115f   :  { %v1515_v60 = vpop.permute.xlu1 %1514 }
0x1160   :  { %v2573_v30 = vadd.f32 %v1525_v41, %v852_v31  ;;  %v1522_v61 = vmul.f32 %v1515_v60, %v1506_v58 }
0x1162   :  { %v1531_v7 = vmin.f32 %v2573_v30, 20.0  ;;  %v1524_v34 = vmul.f32 %v1522_v61, %v838_v39  ;;  %vm1529_vm13 = vcmp.gt.f32.partialorder %v2573_v30, 20.0 }
0x1164   :  { %v1534_v62 = vmul.f32 1.442695, %v1531_v7  ;;  %v848_v63 = vpop.permute.xlu1 %847 }
0x1165   :  { %v2576_v2 = vadd.f32 %v848_v63, %v844_v32  ;;  %v2578_v53 = vadd.f32 %v1524_v34, %v848_v63 }
0x1166   :  { %2070 = vpow2.f32 %v1534_v62 }
0x1167   :  { %v858_v43 = vmin.f32 %v2576_v2, 20.0  ;;  %v1530_v6 = vmin.f32 %v2578_v53, 20.0  ;;  %vm856_vm15 = vcmp.gt.f32.partialorder %v2576_v2, 20.0  ;;  %vm1528_vm1 = vcmp.gt.f32.partialorder %v2578_v53, 20.0 }
0x1169   :  { %v860_v13 = vmul.f32 1.442695, %v858_v43  ;;  %v1532_v1 = vmul.f32 1.442695, %v1530_v6  ;;  %v2582_v15 = vpop.permute.xlu1 %889 }
0x116a   :  { %v970_v58 = vadd.f32 %v2471_v22, %v2582_v15 }
0x116b   :  { %2072 = vpow2.f32 %v860_v13 }
0x116c   :  { %2074 = vpow2.f32 %v1532_v1 }
0x116d   :  { %v894_v19 = vpop.permute.xlu1 %893 }
0x116e   :  { %v975_v5 = vadd.f32 %v2469_v21, %v894_v19  ;;  %v1632_v48 = vadd.f32 %v2565_v23, %v894_v19  ;;  %v1627_v23 = vadd.f32 %v2567_v12, %v2582_v15 }
0x1170   :  { %v2071_v10 = vpop.eup %2070  ;;  %v979_v0 = vadd.f32 %v975_v5, %v887_v4 }
0x1171   :  { %v1545_v11 = vadd.f32 1.0, %v2071_v10  ;;  %v1548_v44 = vmul.f32 -0.5, %v2071_v10  ;;  %v1551_v18 = vand.u32 2147483647, %v2071_v10 }
0x1172   :  { %981 = vst.msk [vmem:[#allocation2 + $0x8] sm:$0xff] %vm352_vm4, %v979_v0 }
0x1173   :  { %2076 = vlog2.f32 %v1545_v11  ;;  %v1549_v17 = vadd.f32 1.0, %v1548_v44  ;;  %vm1552_vm12 = vcmp.lt.f32.partialorder %v1551_v18, 0.0004427343 }
0x1175   :  { %v2073_v38 = vpop.eup %2072  ;;  %v1550_v21 = vmul.f32 %v2071_v10, %v1549_v17 }
0x1176   :  { %v2075_v37 = vpop.eup %2074  ;;  %v864_v47 = vadd.f32 1.0, %v2073_v38  ;;  %v867_v24 = vmul.f32 -0.5, %v2073_v38  ;;  %v870_v39 = vand.u32 2147483647, %v2073_v38 }
0x1177   :  { %v1536_v14 = vadd.f32 1.0, %v2075_v37  ;;  %v1539_v16 = vmul.f32 -0.5, %v2075_v37  ;;  %v1542_v9 = vand.u32 2147483647, %v2075_v37 }
0x1178   :  { %2078 = vlog2.f32 %v864_v47  ;;  %v868_v26 = vadd.f32 1.0, %v867_v24  ;;  %vm871_vm14 = vcmp.lt.f32.partialorder %v870_v39, 0.0004427343 }
0x1179   :  { %2080 = vlog2.f32 %v1536_v14  ;;  %v1540_v49 = vadd.f32 1.0, %v1539_v16  ;;  %vm1543_vm0 = vcmp.lt.f32.partialorder %v1542_v9, 0.0004427343 }
0x117a   :  { %v869_v40 = vmul.f32 %v2073_v38, %v868_v26 }
0x117b   :  { %v1541_v27 = vmul.f32 %v2075_v37, %v1540_v49 }
0x117d   :  { %v2077_v25 = vpop.eup %2076 }
0x117e   :  { %v1547_v29 = vmul.f32 0.6931472, %v2077_v25 }
0x1180   :  { %v1553_v51 = vsel %vm1552_vm12, %v1550_v21, %v1547_v29 }
0x1181   :  { %v1555_v8 = vsel %vm1529_vm13, %v2573_v30, %v1553_v51 }
0x1182   :  { %v2079_v31 = vpop.eup %2078  ;;  %2082 = vtanh.f32 %v1555_v8 }
0x1183   :  { %v2081_v42 = vpop.eup %2080  ;;  %v866_v33 = vmul.f32 0.6931472, %v2079_v31 }
0x1184   :  { %v1538_v35 = vmul.f32 0.6931472, %v2081_v42 }
0x1185   :  { %v872_v46 = vsel %vm871_vm14, %v869_v40, %v866_v33 }
0x1186   :  { %v882_v28 = vsel %vm856_vm15, %v2576_v2, %v872_v46  ;;  %v1544_v36 = vsel %vm1543_vm0, %v1541_v27, %v1538_v35 }
0x1187   :  { %2084 = vtanh.f32 %v882_v28  ;;  %v1554_v20 = vsel %vm1528_vm1, %v2578_v53, %v1544_v36 }
0x1188   :  { %2086 = vtanh.f32 %v1554_v20 }
0x118c   :  { %v2083_v52 = vpop.eup %2082 }
0x118d   :  { %v1559_v50 = vmul.f32 %v2083_v52, %v2573_v30 }
0x118f   :  { %v1636_v54 = vadd.f32 %v1632_v48, %v1559_v50 }
0x1191   :  { %v2085_v55 = vpop.eup %2084  ;;  %1639 = vst.msk [vmem:[#allocation2 + $0x18] sm:$0xff] %vm352_vm4, %v1636_v54 }
0x1192   :  { %v2087_v56 = vpop.eup %2086  ;;  %v886_v57 = vmul.f32 %v2085_v55, %v2576_v2 }
0x1193   :  { %v1558_v59 = vmul.f32 %v2087_v56, %v2578_v53 }
0x1194   :  { %v978_v41 = vadd.f32 %v970_v58, %v886_v57 }
0x1195   :  { %v1635_v45 = vadd.f32 %v1627_v23, %v1558_v59 }
0x1196   :  { %980 = vst.msk [vmem:[#allocation2] sm:$0xff] %vm352_vm4, %v978_v41 }
0x1197   :  { %1638 = vst.msk [vmem:[#allocation2 + $0x10] sm:$0xff] %vm352_vm4, %v1635_v45 }
0x1198   :  { %2101 = shalt.err (!%p2098_p4)
}
0x1199   :  { %s2102_s16 = scalar_lea.hbm %s2619_s4, 512 }
0x119a   :  { %p2103_p5 = scmp.ne.s32.totalorder %s2619_s4, %s2102_s16  ;;  %p2106_p6 = scmp.lt.u32.totalorder %s2102_s16, %s2619_s4 }
0x119c   :  { %p2108_p7 = pnand %p2106_p6, %p2103_p5 }
0x119e   :  { %2111 = shalt.err (!%p2108_p7)
}
0x119f   :  { %s2129_s26 = smov 128   ;;  %s2130_s27 = smov 8  }
0x11a0   :  { %1651 = dma.vmem_to_hbm [thread:$0]  %s1646_s18, 512, %s2619_s4, [#allocation3], %s2129_s26, %s2129_s26, %s2130_s27  }
0x11a1   :  { %2112 = dma.done.wait [#allocation3], 512  }
0x11a2   :  { %2113 = vsyncadd [#allocation3], 4294966784 }
0x11a3   :  { %1655 = vsyncpa [#allocation3], 1 }

</bundles_post_ra>
